<compile_context>
chip_gen: v5e
topology: v5e:2x2
jax: 0.10.0
libtpu: 0.0.40
codegen_flags: <defaults>
</compile_context>

<pallas_src>
import functools

import jax
import jax.numpy as jnp
import numpy as np
from jax import lax
from jax.experimental import pallas as pl
from jax.experimental.pallas import tpu as pltpu

BN_EPS = 1e-5


def _round_up(x, m):
    return ((x + m - 1) // m) * m


def _choose_tile_h(h_dim, w_dim, max_tile_h):
    """Largest divisor of H (<= max_tile_h) keeping blocks lane/sublane aligned."""
    cands = [t for t in range(1, h_dim + 1)
             if h_dim % t == 0 and t <= max_tile_h and (t * w_dim) % 128 == 0]
    if cands:
        return max(cands)
    cands = [t for t in range(1, h_dim + 1)
             if h_dim % t == 0 and t <= max_tile_h and (t * w_dim) % 8 == 0]
    if cands:
        return max(cands)
    return h_dim  # whole image per step: block dims equal full dims -> always legal


# ---------------- Pass 1: shifted-matmul conv + per-tile BN partial moments --

def _conv_stats_kernel(x_ref, w_ref, y_ref, stats_ref, *, kh, kw, tile_h,
                       width, cin_p, cout_pad):
    # x_ref:     (tile_h+kh-1, width+kw-1, cin_p)  bf16 halo-padded NHWC slab
    # w_ref:     (kh*kw, cin_p, cout_pad)          bf16 per-tap weight matrices
    # y_ref:     (tile_h*width, cout_pad)          bf16 pre-BN conv output tile
    # stats_ref: (2, cout_pad)                     f32 per-tile [sum, sum(y^2)]
    slab = x_ref[...]
    acc = jnp.zeros((tile_h * width, cout_pad), jnp.float32)
    for dh in range(kh):                      # unrolled: 9 shifted MXU matmuls
        for dw in range(kw):
            xt = slab[dh:dh + tile_h, dw:dw + width, :]   # (tile_h, width, cin_p)
            xt = xt.reshape(tile_h * width, cin_p)
            acc = acc + jnp.dot(xt, w_ref[dh * kw + dw],
                                preferred_element_type=jnp.float32)
    y_ref[...] = acc.astype(y_ref.dtype)      # bf16 writeback (half the HBM bytes)
    # Per-tile partial moments from the f32 accumulator (XLU reductions are
    # free filler under the matmuls).
    # TODO(synk): E[y^2]-E[y]^2 on f32 partial sums can lose accuracy for very
    # large N*H*W; switch to a Chan/Welford (count, mean, M2) merge if needed.
    stats_ref[0:1, :] = jnp.sum(acc, axis=0, keepdims=True)
    stats_ref[1:2, :] = jnp.sum(acc * acc, axis=0, keepdims=True)


# ---------------- Pass 2: fused normalize + affine + ReLU + NCHW transpose ---

def _bn_relu_nchw_kernel(y_ref, scale_ref, shift_ref, o_ref):
    # scale = gamma * rsqrt(var + eps), shift = beta - mean * scale (pre-folded)
    y = y_ref[...].astype(jnp.float32)                      # (tile_hw, cout_pad)
    z = jnp.maximum(y * scale_ref[...] + shift_ref[...], 0.0)
    o_ref[...] = z.T.astype(o_ref.dtype)                    # (cout_pad, tile_hw)


# ---------------- Wrapper ----------------------------------------------------

@functools.partial(jax.jit, static_argnames=("max_tile_h",))
def conv_block_forward(x, weight, bias, gamma, beta, *, max_tile_h=32):
    # x: (N, Cin, H, W) f32; weight: (Cout, Cin, KH, KW) — PyTorch conventions.
    # Assumes stride=1 and "same" padding (padding = kernel_size // 2), which is
    # how conv_block is used in the Inception network.
    del bias  # exact: Conv2d bias cancels under train-mode BatchNorm (absorbed by mean)

    n, cin, h, w = x.shape
    cout, _, kh, kw = weight.shape
    ph, pw = kh // 2, kw // 2

    cin_p = _round_up(cin, 8)
    cout_pad = _round_up(cout, 128)
    tile_h = _choose_tile_h(h, w, max_tile_h)
    n_ht = h // tile_h
    tile_hw = tile_h * w
    hw = h * w
    m = n * hw

    # --- input: NHWC, zero halo + Cin padding, overlapping h-slabs -----------
    # Duplication is only the (kh-1) halo rows per tile (~25% at tile_h=8),
    # vs. the 9x-32x blow-up of a materialized im2col.
    x_nhwc = jnp.transpose(x, (0, 2, 3, 1))
    xp = jnp.pad(x_nhwc, ((0, 0), (ph, ph), (pw, pw), (0, cin_p - cin)))
    slabs = jnp.stack(
        [xp[:, t * tile_h: t * tile_h + tile_h + kh - 1] for t in range(n_ht)],
        axis=1).astype(jnp.bfloat16)     # (N, n_ht, tile_h+kh-1, w+kw-1, cin_p)

    # --- weight: per-tap (Cin, Cout) matrices, tap-major ---------------------
    w_taps = jnp.transpose(weight, (2, 3, 1, 0)).reshape(kh * kw, cin, cout)
    w_taps = jnp.pad(w_taps, ((0, 0), (0, cin_p - cin), (0, cout_pad - cout)))
    w_taps = w_taps.astype(jnp.bfloat16)           # (kh*kw, cin_p, cout_pad)

    cparams = pltpu.CompilerParams(
        dimension_semantics=("parallel", "parallel"),
        vmem_limit_bytes=64 * 1024 * 1024,
    )

    # --- Pass 1: conv (9 shifted matmuls) + per-tile [sum, sumsq] ------------
    kern1 = functools.partial(_conv_stats_kernel, kh=kh, kw=kw, tile_h=tile_h,
                              width=w, cin_p=cin_p, cout_pad=cout_pad)
    cost1 = pl.CostEstimate(
        flops=2 * m * kh * kw * cin_p * cout_pad + 3 * m * cout_pad,
        transcendentals=0,
        bytes_accessed=(slabs.size * 2 + w_taps.size * 2
                        + m * cout_pad * 2 + n * n_ht * 2 * cout_pad * 4))
    y_flat, part_stats = pl.pallas_call(
        kern1,
        out_shape=(jax.ShapeDtypeStruct((n, hw, cout_pad), jnp.bfloat16),
                   jax.ShapeDtypeStruct((n, n_ht, 2, cout_pad), jnp.float32)),
        grid_spec=pltpu.PrefetchScalarGridSpec(
            num_scalar_prefetch=0,
            grid=(n, n_ht),
            in_specs=[
                pl.BlockSpec((None, None, tile_h + kh - 1, w + kw - 1, cin_p),
                             lambda b, t: (b, t, 0, 0, 0)),
                # Weight stays resident (constant index map -> never re-fetched).
                pl.BlockSpec((kh * kw, cin_p, cout_pad), lambda b, t: (0, 0, 0)),
            ],
            out_specs=[
                pl.BlockSpec((None, tile_hw, cout_pad), lambda b, t: (b, t, 0)),
                pl.BlockSpec((None, None, 2, cout_pad), lambda b, t: (b, t, 0, 0)),
            ]),
        compiler_params=cparams,
        cost_estimate=cost1,
    )(slabs, w_taps)

    # --- tiny cross-tile reduction + BN scale/shift fold (XLA glue) ----------
    stats = jnp.sum(part_stats, axis=(0, 1))               # (2, cout_pad)
    mean = stats[0] / float(m)
    var = jnp.maximum(stats[1] / float(m) - mean * mean, 0.0)
    gamma_p = jnp.pad(gamma.astype(jnp.float32), (0, cout_pad - cout))
    beta_p = jnp.pad(beta.astype(jnp.float32), (0, cout_pad - cout))
    scale = gamma_p * lax.rsqrt(var + BN_EPS)               # (cout_pad,)
    shift = beta_p - mean * scale                           # (cout_pad,)

    # --- Pass 2: (y*scale + shift), ReLU, per-tile transpose to channel-major -
    tile_hw2 = tile_hw if tile_hw % 128 == 0 else hw        # keep out stores legal/dense
    n_t2 = hw // tile_hw2
    cost2 = pl.CostEstimate(
        flops=3 * m * cout_pad, transcendentals=0,
        bytes_accessed=m * cout_pad * (2 + 4) + 2 * cout_pad * 4)
    out_cm = pl.pallas_call(
        _bn_relu_nchw_kernel,
        out_shape=jax.ShapeDtypeStruct((n, cout_pad, hw), jnp.float32),
        grid_spec=pltpu.PrefetchScalarGridSpec(
            num_scalar_prefetch=0,
            grid=(n, n_t2),
            in_specs=[
                pl.BlockSpec((None, tile_hw2, cout_pad), lambda b, t: (b, t, 0)),
                pl.BlockSpec((1, cout_pad), lambda b, t: (0, 0)),
                pl.BlockSpec((1, cout_pad), lambda b, t: (0, 0)),
            ],
            out_specs=pl.BlockSpec((None, cout_pad, tile_hw2),
                                   lambda b, t: (b, 0, t))),
        compiler_params=cparams,
        cost_estimate=cost2,
    )(y_flat, scale.reshape(1, cout_pad), shift.reshape(1, cout_pad))

    # (N, Cout_pad, H*W) -> (N, Cout, H, W).  No transpose; the channel slice
    # is a no-op whenever Cout is already a multiple of 128.
    return out_cm[:, :cout, :].reshape(n, cout, h, w)


# ---------------- Reference (matches kernel's bf16-operand conv) -------------

def reference_forward(x, weight, bias, gamma, beta):
    y = lax.conv_general_dilated(
        x.astype(jnp.bfloat16), weight.astype(jnp.bfloat16),
        window_strides=(1, 1), padding=((1, 1), (1, 1)),
        dimension_numbers=("NCHW", "OIHW", "NCHW"),
        preferred_element_type=jnp.float32)
    y = y + bias.reshape(1, -1, 1, 1)   # bias kept here; cancels under train-mode BN
    mean = jnp.mean(y, axis=(0, 2, 3), keepdims=True)
    var = jnp.mean((y - mean) ** 2, axis=(0, 2, 3), keepdims=True)
    y = (y - mean) * lax.rsqrt(var + BN_EPS)
    y = y * gamma.reshape(1, -1, 1, 1) + beta.reshape(1, -1, 1, 1)
    return jnp.maximum(y, 0.0)


if __name__ == "__main__":
    # Shapes consistent with conv_block(in_channels=4, out_channels=8,
    # kernel_size=3, padding=1) applied to a (2, 4, 16, 16) NCHW input.
    N, CIN, COUT, H, W, KH, KW = 2, 4, 8, 16, 16, 3, 3

    key = jax.random.PRNGKey(0)
    kx, kw_, kb, kg, kbe = jax.random.split(key, 5)
    x = jax.random.normal(kx, (N, CIN, H, W), dtype=jnp.float32)
    weight = jax.random.normal(kw_, (COUT, CIN, KH, KW), dtype=jnp.float32) * 0.1
    bias = jax.random.normal(kb, (COUT,), dtype=jnp.float32) * 0.1
    gamma = 1.0 + 0.1 * jax.random.normal(kg, (COUT,), dtype=jnp.float32)
    beta = 0.1 * jax.random.normal(kbe, (COUT,), dtype=jnp.float32)

    # max_tile_h=8 -> tile_h=8 and a (2 x 2) grid, so the multi-tile partial
    # stats + cross-tile reduction path is exercised (production default 32).
    out = conv_block_forward(x, weight, bias, gamma, beta, max_tile_h=8)
    out = jax.block_until_ready(out)

    ref = reference_forward(x, weight, bias, gamma, beta)
    assert out.shape == (N, COUT, H, W), out.shape
    # bf16 matmul operands + bf16 intermediate y -> ~1e-2 absolute tolerance.
    np.testing.assert_allclose(np.asarray(out), np.asarray(ref),
                               rtol=2e-2, atol=2e-2)

    print("KERNEL_OK")
</pallas_src>

<mosaic_0001>
module attributes {stable_mosaic.version = 11 : i64} {
  func.func @_conv_stats_kernel(%arg0: i32, %arg1: i32, %arg2: memref<1x1x10x18x8xbf16, #tpu.memory_space<vmem>>, %arg3: memref<9x8x128xbf16, #tpu.memory_space<vmem>>, %arg4: memref<1x128x128xbf16, #tpu.memory_space<vmem>>, %arg5: memref<1x1x2x128xf32, #tpu.memory_space<vmem>>) attributes {dimension_semantics = [#tpu.dimension_semantics<parallel>, #tpu.dimension_semantics<parallel>], iteration_bounds = array<i64: 2, 2>, scalar_prefetch = 0 : i64, scratch_operands = 0 : i64, tpu.core_type = #tpu.core_type<tc>, window_params = [{transform_indices = @transform_0, window_bounds = array<i64: 1, 1, 10, 18, 8>}, {pipeline_mode = #tpu.pipeline_mode<synchronous>, transform_indices = @transform_1, window_bounds = array<i64: 9, 8, 128>}, {transform_indices = @transform_2, window_bounds = array<i64: 1, 128, 128>}, {transform_indices = @transform_3, window_bounds = array<i64: 1, 1, 2, 128>}]} {
    %c0 = arith.constant 0 : index
    %c0_0 = arith.constant 0 : index
    %c0_1 = arith.constant 0 : index
    %c0_2 = arith.constant 0 : index
    %c0_3 = arith.constant 0 : index
    %0 = vector.load %arg2[%c0, %c0_0, %c0_1, %c0_2, %c0_3] : memref<1x1x10x18x8xbf16, #tpu.memory_space<vmem>>, vector<1x1x10x18x8xbf16>
    %1 = vector.shape_cast %0 : vector<1x1x10x18x8xbf16> to vector<10x18x8xbf16>
    %cst = arith.constant 0.000000e+00 : f32
    %2 = vector.broadcast %cst : f32 to vector<128x128xf32>
    %3 = vector.extract_strided_slice %1 {offsets = [0, 0, 0], sizes = [8, 16, 8], strides = [1, 1, 1]} : vector<10x18x8xbf16> to vector<8x16x8xbf16>
    %4 = vector.shape_cast %3 : vector<8x16x8xbf16> to vector<128x8xbf16>
    %c0_4 = arith.constant 0 : index
    %c0_5 = arith.constant 0 : index
    %c0_6 = arith.constant 0 : index
    %5 = vector.load %arg3[%c0_4, %c0_5, %c0_6] : memref<9x8x128xbf16, #tpu.memory_space<vmem>>, vector<1x8x128xbf16>
    %6 = vector.shape_cast %5 : vector<1x8x128xbf16> to vector<8x128xbf16>
    %cst_7 = arith.constant dense<0.000000e+00> : vector<128x128xf32>
    %7 = tpu.matmul %4, %6, %cst_7 {dimension_numbers = #tpu.dot_dimension_numbers<[1], [0], [0], [1], [0, 0, 1, 1], [], []>} : vector<128x8xbf16>, vector<8x128xbf16>, vector<128x128xf32> -> vector<128x128xf32>
    %8 = arith.addf %2, %7 : vector<128x128xf32>
    %9 = vector.extract_strided_slice %1 {offsets = [0, 1, 0], sizes = [8, 16, 8], strides = [1, 1, 1]} : vector<10x18x8xbf16> to vector<8x16x8xbf16>
    %10 = vector.shape_cast %9 : vector<8x16x8xbf16> to vector<128x8xbf16>
    %c1 = arith.constant 1 : index
    %c0_8 = arith.constant 0 : index
    %c0_9 = arith.constant 0 : index
    %11 = vector.load %arg3[%c1, %c0_8, %c0_9] : memref<9x8x128xbf16, #tpu.memory_space<vmem>>, vector<1x8x128xbf16>
    %12 = vector.shape_cast %11 : vector<1x8x128xbf16> to vector<8x128xbf16>
    %cst_10 = arith.constant dense<0.000000e+00> : vector<128x128xf32>
    %13 = tpu.matmul %10, %12, %cst_10 {dimension_numbers = #tpu.dot_dimension_numbers<[1], [0], [0], [1], [0, 0, 1, 1], [], []>} : vector<128x8xbf16>, vector<8x128xbf16>, vector<128x128xf32> -> vector<128x128xf32>
    %14 = arith.addf %8, %13 : vector<128x128xf32>
    %15 = vector.extract_strided_slice %1 {offsets = [0, 2, 0], sizes = [8, 16, 8], strides = [1, 1, 1]} : vector<10x18x8xbf16> to vector<8x16x8xbf16>
    %16 = vector.shape_cast %15 : vector<8x16x8xbf16> to vector<128x8xbf16>
    %c2 = arith.constant 2 : index
    %c0_11 = arith.constant 0 : index
    %c0_12 = arith.constant 0 : index
    %17 = vector.load %arg3[%c2, %c0_11, %c0_12] : memref<9x8x128xbf16, #tpu.memory_space<vmem>>, vector<1x8x128xbf16>
    %18 = vector.shape_cast %17 : vector<1x8x128xbf16> to vector<8x128xbf16>
    %cst_13 = arith.constant dense<0.000000e+00> : vector<128x128xf32>
    %19 = tpu.matmul %16, %18, %cst_13 {dimension_numbers = #tpu.dot_dimension_numbers<[1], [0], [0], [1], [0, 0, 1, 1], [], []>} : vector<128x8xbf16>, vector<8x128xbf16>, vector<128x128xf32> -> vector<128x128xf32>
    %20 = arith.addf %14, %19 : vector<128x128xf32>
    %21 = vector.extract_strided_slice %1 {offsets = [1, 0, 0], sizes = [8, 16, 8], strides = [1, 1, 1]} : vector<10x18x8xbf16> to vector<8x16x8xbf16>
    %22 = vector.shape_cast %21 : vector<8x16x8xbf16> to vector<128x8xbf16>
    %c3 = arith.constant 3 : index
    %c0_14 = arith.constant 0 : index
    %c0_15 = arith.constant 0 : index
    %23 = vector.load %arg3[%c3, %c0_14, %c0_15] : memref<9x8x128xbf16, #tpu.memory_space<vmem>>, vector<1x8x128xbf16>
    %24 = vector.shape_cast %23 : vector<1x8x128xbf16> to vector<8x128xbf16>
    %cst_16 = arith.constant dense<0.000000e+00> : vector<128x128xf32>
    %25 = tpu.matmul %22, %24, %cst_16 {dimension_numbers = #tpu.dot_dimension_numbers<[1], [0], [0], [1], [0, 0, 1, 1], [], []>} : vector<128x8xbf16>, vector<8x128xbf16>, vector<128x128xf32> -> vector<128x128xf32>
    %26 = arith.addf %20, %25 : vector<128x128xf32>
    %27 = vector.extract_strided_slice %1 {offsets = [1, 1, 0], sizes = [8, 16, 8], strides = [1, 1, 1]} : vector<10x18x8xbf16> to vector<8x16x8xbf16>
    %28 = vector.shape_cast %27 : vector<8x16x8xbf16> to vector<128x8xbf16>
    %c4 = arith.constant 4 : index
    %c0_17 = arith.constant 0 : index
    %c0_18 = arith.constant 0 : index
    %29 = vector.load %arg3[%c4, %c0_17, %c0_18] : memref<9x8x128xbf16, #tpu.memory_space<vmem>>, vector<1x8x128xbf16>
    %30 = vector.shape_cast %29 : vector<1x8x128xbf16> to vector<8x128xbf16>
    %cst_19 = arith.constant dense<0.000000e+00> : vector<128x128xf32>
    %31 = tpu.matmul %28, %30, %cst_19 {dimension_numbers = #tpu.dot_dimension_numbers<[1], [0], [0], [1], [0, 0, 1, 1], [], []>} : vector<128x8xbf16>, vector<8x128xbf16>, vector<128x128xf32> -> vector<128x128xf32>
    %32 = arith.addf %26, %31 : vector<128x128xf32>
    %33 = vector.extract_strided_slice %1 {offsets = [1, 2, 0], sizes = [8, 16, 8], strides = [1, 1, 1]} : vector<10x18x8xbf16> to vector<8x16x8xbf16>
    %34 = vector.shape_cast %33 : vector<8x16x8xbf16> to vector<128x8xbf16>
    %c5 = arith.constant 5 : index
    %c0_20 = arith.constant 0 : index
    %c0_21 = arith.constant 0 : index
    %35 = vector.load %arg3[%c5, %c0_20, %c0_21] : memref<9x8x128xbf16, #tpu.memory_space<vmem>>, vector<1x8x128xbf16>
    %36 = vector.shape_cast %35 : vector<1x8x128xbf16> to vector<8x128xbf16>
    %cst_22 = arith.constant dense<0.000000e+00> : vector<128x128xf32>
    %37 = tpu.matmul %34, %36, %cst_22 {dimension_numbers = #tpu.dot_dimension_numbers<[1], [0], [0], [1], [0, 0, 1, 1], [], []>} : vector<128x8xbf16>, vector<8x128xbf16>, vector<128x128xf32> -> vector<128x128xf32>
    %38 = arith.addf %32, %37 : vector<128x128xf32>
    %39 = vector.extract_strided_slice %1 {offsets = [2, 0, 0], sizes = [8, 16, 8], strides = [1, 1, 1]} : vector<10x18x8xbf16> to vector<8x16x8xbf16>
    %40 = vector.shape_cast %39 : vector<8x16x8xbf16> to vector<128x8xbf16>
    %c6 = arith.constant 6 : index
    %c0_23 = arith.constant 0 : index
    %c0_24 = arith.constant 0 : index
    %41 = vector.load %arg3[%c6, %c0_23, %c0_24] : memref<9x8x128xbf16, #tpu.memory_space<vmem>>, vector<1x8x128xbf16>
    %42 = vector.shape_cast %41 : vector<1x8x128xbf16> to vector<8x128xbf16>
    %cst_25 = arith.constant dense<0.000000e+00> : vector<128x128xf32>
    %43 = tpu.matmul %40, %42, %cst_25 {dimension_numbers = #tpu.dot_dimension_numbers<[1], [0], [0], [1], [0, 0, 1, 1], [], []>} : vector<128x8xbf16>, vector<8x128xbf16>, vector<128x128xf32> -> vector<128x128xf32>
    %44 = arith.addf %38, %43 : vector<128x128xf32>
    %45 = vector.extract_strided_slice %1 {offsets = [2, 1, 0], sizes = [8, 16, 8], strides = [1, 1, 1]} : vector<10x18x8xbf16> to vector<8x16x8xbf16>
    %46 = vector.shape_cast %45 : vector<8x16x8xbf16> to vector<128x8xbf16>
    %c7 = arith.constant 7 : index
    %c0_26 = arith.constant 0 : index
    %c0_27 = arith.constant 0 : index
    %47 = vector.load %arg3[%c7, %c0_26, %c0_27] : memref<9x8x128xbf16, #tpu.memory_space<vmem>>, vector<1x8x128xbf16>
    %48 = vector.shape_cast %47 : vector<1x8x128xbf16> to vector<8x128xbf16>
    %cst_28 = arith.constant dense<0.000000e+00> : vector<128x128xf32>
    %49 = tpu.matmul %46, %48, %cst_28 {dimension_numbers = #tpu.dot_dimension_numbers<[1], [0], [0], [1], [0, 0, 1, 1], [], []>} : vector<128x8xbf16>, vector<8x128xbf16>, vector<128x128xf32> -> vector<128x128xf32>
    %50 = arith.addf %44, %49 : vector<128x128xf32>
    %51 = vector.extract_strided_slice %1 {offsets = [2, 2, 0], sizes = [8, 16, 8], strides = [1, 1, 1]} : vector<10x18x8xbf16> to vector<8x16x8xbf16>
    %52 = vector.shape_cast %51 : vector<8x16x8xbf16> to vector<128x8xbf16>
    %c8 = arith.constant 8 : index
    %c0_29 = arith.constant 0 : index
    %c0_30 = arith.constant 0 : index
    %53 = vector.load %arg3[%c8, %c0_29, %c0_30] : memref<9x8x128xbf16, #tpu.memory_space<vmem>>, vector<1x8x128xbf16>
    %54 = vector.shape_cast %53 : vector<1x8x128xbf16> to vector<8x128xbf16>
    %cst_31 = arith.constant dense<0.000000e+00> : vector<128x128xf32>
    %55 = tpu.matmul %52, %54, %cst_31 {dimension_numbers = #tpu.dot_dimension_numbers<[1], [0], [0], [1], [0, 0, 1, 1], [], []>} : vector<128x8xbf16>, vector<8x128xbf16>, vector<128x128xf32> -> vector<128x128xf32>
    %56 = arith.addf %50, %55 : vector<128x128xf32>
    %57 = arith.truncf %56 : vector<128x128xf32> to vector<128x128xbf16>
    %c0_32 = arith.constant 0 : index
    %c0_33 = arith.constant 0 : index
    %c0_34 = arith.constant 0 : index
    %58 = vector.load %arg4[%c0_32, %c0_33, %c0_34] : memref<1x128x128xbf16, #tpu.memory_space<vmem>>, vector<1x128x128xbf16>
    %59 = vector.shape_cast %58 : vector<1x128x128xbf16> to vector<128x128xbf16>
    %60 = vector.shape_cast %57 : vector<128x128xbf16> to vector<1x128x128xbf16>
    tpu.vector_store %arg4[%c0_32, %c0_33, %c0_34], %60 {strides = array<i32>} : memref<1x128x128xbf16, #tpu.memory_space<vmem>>, vector<1x128x128xbf16>,
    %cst_35 = arith.constant dense<0.000000e+00> : vector<128xf32>
    %61 = vector.multi_reduction <add>, %56, %cst_35 [0] : vector<128x128xf32> to vector<128xf32>
    %62 = vector.shape_cast %61 : vector<128xf32> to vector<1x128xf32>
    %c0_36 = arith.constant 0 : index
    %c0_37 = arith.constant 0 : index
    %c0_38 = arith.constant 0 : index
    %c0_39 = arith.constant 0 : index
    %63 = vector.load %arg5[%c0_36, %c0_37, %c0_38, %c0_39] : memref<1x1x2x128xf32, #tpu.memory_space<vmem>>, vector<1x1x1x128xf32>
    %64 = vector.shape_cast %63 : vector<1x1x1x128xf32> to vector<1x128xf32>
    %65 = vector.shape_cast %62 : vector<1x128xf32> to vector<1x1x1x128xf32>
    tpu.vector_store %arg5[%c0_36, %c0_37, %c0_38, %c0_39], %65 {strides = array<i32>} : memref<1x1x2x128xf32, #tpu.memory_space<vmem>>, vector<1x1x1x128xf32>,
    %66 = arith.mulf %56, %56 : vector<128x128xf32>
    %cst_40 = arith.constant dense<0.000000e+00> : vector<128xf32>
    %67 = vector.multi_reduction <add>, %66, %cst_40 [0] : vector<128x128xf32> to vector<128xf32>
    %68 = vector.shape_cast %67 : vector<128xf32> to vector<1x128xf32>
    %c0_41 = arith.constant 0 : index
    %c0_42 = arith.constant 0 : index
    %c1_43 = arith.constant 1 : index
    %c0_44 = arith.constant 0 : index
    %69 = vector.load %arg5[%c0_41, %c0_42, %c1_43, %c0_44] : memref<1x1x2x128xf32, #tpu.memory_space<vmem>>, vector<1x1x1x128xf32>
    %70 = vector.shape_cast %69 : vector<1x1x1x128xf32> to vector<1x128xf32>
    %71 = vector.shape_cast %68 : vector<1x128xf32> to vector<1x1x1x128xf32>
    tpu.vector_store %arg5[%c0_41, %c0_42, %c1_43, %c0_44], %71 {strides = array<i32>} : memref<1x1x2x128xf32, #tpu.memory_space<vmem>>, vector<1x1x1x128xf32>,
    return
  }
  func.func @transform_0(%arg0: i32, %arg1: i32) -> (i32, i32, i32, i32, i32) {
    %c0_i32 = arith.constant 0 : i32
    %c0_i32_0 = arith.constant 0 : i32
    %c0_i32_1 = arith.constant 0 : i32
    %c0_i32_2 = arith.constant 0 : i32
    return %arg0, %arg1, %c0_i32, %c0_i32_0, %c0_i32_1 : i32, i32, i32, i32, i32
  }
  func.func @transform_1(%arg0: i32, %arg1: i32) -> (i32, i32, i32) {
    %c0_i32 = arith.constant 0 : i32
    %c0_i32_0 = arith.constant 0 : i32
    %c0_i32_1 = arith.constant 0 : i32
    %c0_i32_2 = arith.constant 0 : i32
    return %c0_i32, %c0_i32_0, %c0_i32_1 : i32, i32, i32
  }
  func.func @transform_2(%arg0: i32, %arg1: i32) -> (i32, i32, i32) {
    %c0_i32 = arith.constant 0 : i32
    %c0_i32_0 = arith.constant 0 : i32
    return %arg0, %arg1, %c0_i32 : i32, i32, i32
  }
  func.func @transform_3(%arg0: i32, %arg1: i32) -> (i32, i32, i32, i32) {
    %c0_i32 = arith.constant 0 : i32
    %c0_i32_0 = arith.constant 0 : i32
    %c0_i32_1 = arith.constant 0 : i32
    return %arg0, %arg1, %c0_i32, %c0_i32_0 : i32, i32, i32, i32
  }
}

module attributes {stable_mosaic.version = 11 : i64} {
  func.func @_bn_relu_nchw_kernel(%arg0: i32, %arg1: i32, %arg2: memref<1x128x128xbf16, #tpu.memory_space<vmem>>, %arg3: memref<1x128xf32, #tpu.memory_space<vmem>>, %arg4: memref<1x128xf32, #tpu.memory_space<vmem>>, %arg5: memref<1x128x128xf32, #tpu.memory_space<vmem>>) attributes {dimension_semantics = [#tpu.dimension_semantics<parallel>, #tpu.dimension_semantics<parallel>], iteration_bounds = array<i64: 2, 2>, scalar_prefetch = 0 : i64, scratch_operands = 0 : i64, tpu.core_type = #tpu.core_type<tc>, window_params = [{transform_indices = @transform_0, window_bounds = array<i64: 1, 128, 128>}, {pipeline_mode = #tpu.pipeline_mode<synchronous>, transform_indices = @transform_1, window_bounds = array<i64: 1, 128>}, {pipeline_mode = #tpu.pipeline_mode<synchronous>, transform_indices = @transform_2, window_bounds = array<i64: 1, 128>}, {transform_indices = @transform_3, window_bounds = array<i64: 1, 128, 128>}]} {
    %c0 = arith.constant 0 : index
    %c0_0 = arith.constant 0 : index
    %c0_1 = arith.constant 0 : index
    %0 = vector.load %arg2[%c0, %c0_0, %c0_1] : memref<1x128x128xbf16, #tpu.memory_space<vmem>>, vector<1x128x128xbf16>
    %1 = vector.shape_cast %0 : vector<1x128x128xbf16> to vector<128x128xbf16>
    %2 = arith.extf %1 : vector<128x128xbf16> to vector<128x128xf32>
    %c0_2 = arith.constant 0 : index
    %c0_3 = arith.constant 0 : index
    %3 = vector.load %arg3[%c0_2, %c0_3] : memref<1x128xf32, #tpu.memory_space<vmem>>, vector<1x128xf32>
    %4 = vector.broadcast %3 : vector<1x128xf32> to vector<128x128xf32>
    %5 = arith.mulf %2, %4 : vector<128x128xf32>
    %c0_4 = arith.constant 0 : index
    %c0_5 = arith.constant 0 : index
    %6 = vector.load %arg4[%c0_4, %c0_5] : memref<1x128xf32, #tpu.memory_space<vmem>>, vector<1x128xf32>
    %7 = vector.broadcast %6 : vector<1x128xf32> to vector<128x128xf32>
    %8 = arith.addf %5, %7 : vector<128x128xf32>
    %cst = arith.constant 0.000000e+00 : f32
    %9 = vector.broadcast %cst : f32 to vector<128x128xf32>
    %10 = arith.maximumf %8, %9 : vector<128x128xf32>
    %11 = tpu.transpose %10, [1, 0] : vector<128x128xf32> -> vector<128x128xf32>
    %c0_6 = arith.constant 0 : index
    %c0_7 = arith.constant 0 : index
    %c0_8 = arith.constant 0 : index
    %12 = vector.load %arg5[%c0_6, %c0_7, %c0_8] : memref<1x128x128xf32, #tpu.memory_space<vmem>>, vector<1x128x128xf32>
    %13 = vector.shape_cast %12 : vector<1x128x128xf32> to vector<128x128xf32>
    %14 = vector.shape_cast %11 : vector<128x128xf32> to vector<1x128x128xf32>
    tpu.vector_store %arg5[%c0_6, %c0_7, %c0_8], %14 {strides = array<i32>} : memref<1x128x128xf32, #tpu.memory_space<vmem>>, vector<1x128x128xf32>,
    return
  }
  func.func @transform_0(%arg0: i32, %arg1: i32) -> (i32, i32, i32) {
    %c0_i32 = arith.constant 0 : i32
    %c0_i32_0 = arith.constant 0 : i32
    return %arg0, %arg1, %c0_i32 : i32, i32, i32
  }
  func.func @transform_1(%arg0: i32, %arg1: i32) -> (i32, i32) {
    %c0_i32 = arith.constant 0 : i32
    %c0_i32_0 = arith.constant 0 : i32
    %c0_i32_1 = arith.constant 0 : i32
    return %c0_i32, %c0_i32_0 : i32, i32
  }
  func.func @transform_2(%arg0: i32, %arg1: i32) -> (i32, i32) {
    %c0_i32 = arith.constant 0 : i32
    %c0_i32_0 = arith.constant 0 : i32
    %c0_i32_1 = arith.constant 0 : i32
    return %c0_i32, %c0_i32_0 : i32, i32
  }
  func.func @transform_3(%arg0: i32, %arg1: i32) -> (i32, i32, i32) {
    %c0_i32 = arith.constant 0 : i32
    %c0_i32_0 = arith.constant 0 : i32
    return %arg0, %c0_i32, %arg1 : i32, i32, i32
  }
}

</mosaic_0001>

<bundles_post_ra>
// kernel: conv_block_forward.3
= control target key start
LH: loop header
LB: loop body
LE: loop exit
PB: predicated region body
PF: predicated region fallthrough
CT: control target
= control target key end

     0   :  { %s692_s12 = smov 0   ;;  %s694_s13 = smov 0   ;;  %s872_s0 = inlined_call_operand.vmem [shape: bf16[2,256,128], index: 0, kind: input, shape index: {}]   ;;  %s873_s1 = inlined_call_operand.vmem [shape: f32[1,128], index: 1, kind: input, shape index: {}]   ;;  %s874_s2 = inlined_call_operand.vmem [shape: f32[1,128], index: 2, kind: input, shape index: {}]   ;;  %s875_s3 = inlined_call_operand.vmem [shape: f32[2,128,256], index: 3, kind: output, shape index: {}]  }
   0x1   :  { %s696_s14 = smov 0   ;;  %s698_s15 = smov 0  }
   0x2   :  { %s700_s16 = smov 0   ;;  %s702_s17 = smov 0  }
   0x3   :  { %s704_s18 = smov 0  }
   0x4 LB: > { %s22_s19 = sadd.s32 1, %s662_s16  ;;  %s25_s20 = sadd.s32 1, %s666_s17  ;;  %s670_s18 = sphi %s704_s18, %s13_s18   ;;  %s666_s17 = sphi %s702_s17, %s882_s17   ;;  %s662_s16 = sphi %s700_s16, %s881_s16   ;;  %s658_s15 = sphi %s698_s15, %s880_s15   ;;  %s654_s14 = sphi %s696_s14, %s879_s14   ;;  %s650_s13 = sphi %s694_s13, %s878_s13   ;;  %s646_s12 = sphi %s692_s12, %s877_s12  }
   0x5   : > { %p23_p0 = scmp.ge.s32.totalorder %s22_s19, 2  ;;  %s505_s21 = sadd.s32 4294967295, %s670_s18  }
   0x6   : > { %p114_p1 = scmp.ne.s32.totalorder %s650_s13, %s646_s12  ;;  %p115_p2 = scmp.eq.s32.totalorder %s505_s21, 3 }
   0x7   : > { %s884_s19 = smov (%p23_p0, %s22_s19), 0  ;;  %s886_s20 = smov (!%p23_p0, %s25_s20), %s666_s17 }
   0x8   : > { %s100_s22 = ssub.s32 %s662_s16, %s884_s19  ;;  %p27_p3 = scmp.ge.s32.totalorder %s886_s20, 2 }
   0x9   : > { %p509_p4 = scmp.ge.s32.totalorder %s670_s18, 1  ;;  %p738_p5 = por %p115_p2, %p114_p1 }
   0xa   : > { %p158_p6 = scmp.lt.s32.totalorder %s670_s18, 5  ;;  %s888_s20 = smov (%p27_p3, %s886_s20), 0 }
   0xb   : > { %s99_s24 = ssub.s32 %s666_s17, %s888_s20  ;;  %s104_s26 = sadd.s32 1, %s650_s13 }
   0xc   : > { %p159_p7 = pnand %p509_p4, %p158_p6  ;;  %s101_s25 = sor.u32 %s100_s22, %s99_s24 }
   0xd   : > { %p102_p8 = scmp.eq.s32.totalorder %s101_s25, 0  ;;  %s511_s28 = sshll.u32 (!%p159_p7), %s654_s14, 4 }
   0xe   : > { %162 = sbr.rel (%p159_p7) target bundleno = 328 (0x148), region = 32  ;;  %p186_p9 = scmp.lt.s32.totalorder (!%p159_p7), %s658_s15, 1 }
   0xf   : > { %s749_s27 = scalar_select %p102_p8, %s650_s13, %s104_s26  }
  0x10   : > { %p188_p10 = scmp.lt.s32.totalorder (!%p159_p7), %s511_s28, 31  ;;  %s182_s22 = sand.u32 (!%p159_p7), 1, %s646_s12  }
  0x11   : > { %s510_s24 = sshll.u32 (!%p159_p7), %s182_s22, 7 }
  0x12   : > { %s810_s25 = scalar_lea.vmem (!%p159_p7), [#allocation2], %s510_s24 }
  0x13   : > { %s187_s29 = scalar_select %p186_p9, %s658_s15, 1  ;;  %v762_v0 = vld [vmem:[%s873_s1] ss:$0 sm:$0xff] }
  0x14   : > { %s890_s28 = smov (!%p188_p10, %s511_s28), 31  ;;  %v768_v3 = vld [vmem:[%s874_s2] ss:$0 sm:$0xff]  ;;  %s515_s12 = sshll.u32 (%p738_p5), %s658_s15, 5 }
  0x15   : > { %s512_s30 = sshll.u32 %s187_s29, 5  ;;  %s339_s26 = sadd.s32 (%p738_p5), %s654_s14, %s515_s12 }
  0x16   : > { %s191_s4 = sadd.s32 %s512_s30, %s890_s28  ;;  %s516_s28 = sshll.u32 (%p738_p5), %s339_s26, 3 }
  0x17   : > { %s513_s5 = sshll.u32 %s191_s4, 2  ;;  %s341_s23 = scalar_lea.vmem (%p738_p5), %s875_s3, %s516_s28 }
  0x18   : > { %s757_s8 = scalar_lea.vmem %s872_s0, %s513_s5 }
  0x19   : > { %v520_v1 = vld [vmem:[%s757_s8] sm:$0xff]   ;;  %v551_v8 = vld [vmem:[%s757_s8 + $0x8] sm:$0xff]   ;;  %v552_v18 = vld [vmem:[%s757_s8 + $0x10] sm:$0xff]  }
  0x1a   : > { %v521_v2 = vunpack.c.l.bf16 %v520_v1  ;;  %v522_v4 = vunpack.c.h.bf16 %v520_v1  ;;  %v525_v11 = vunpack.c.l.bf16 %v551_v8  ;;  %v526_v15 = vunpack.c.h.bf16 %v551_v8  ;;  %v553_v27 = vld [vmem:[%s757_s8 + $0x18] sm:$0xff]   ;;  %v554_v36 = vld [vmem:[%s757_s8 + $0x20] sm:$0xff]   ;;  %v555_v45 = vld [vmem:[%s757_s8 + $0x28] sm:$0xff]  }
  0x1b   : > { %v529_v20 = vunpack.c.l.bf16 %v552_v18  ;;  %v530_v24 = vunpack.c.h.bf16 %v552_v18  ;;  %v533_v29 = vunpack.c.l.bf16 %v553_v27  ;;  %v534_v33 = vunpack.c.h.bf16 %v553_v27  ;;  %v556_v54 = vld [vmem:[%s757_s8 + $0x30] sm:$0xff]   ;;  %v557_v63 = vld [vmem:[%s757_s8 + $0x38] sm:$0xff]  }
  0x1c   : > { %v231_v5 = vmul.f32 %v762_v0, %v521_v2  ;;  %v232_v7 = vmul.f32 %v762_v0, %v522_v4  ;;  %v233_v13 = vmul.f32 %v762_v0, %v525_v11  ;;  %v234_v17 = vmul.f32 %v762_v0, %v526_v15 }
  0x1d   : > { %v235_v22 = vmul.f32 %v762_v0, %v529_v20  ;;  %v236_v26 = vmul.f32 %v762_v0, %v530_v24  ;;  %v237_v31 = vmul.f32 %v762_v0, %v533_v29  ;;  %v238_v35 = vmul.f32 %v762_v0, %v534_v33 }
  0x1e   : > { %v251_v6 = vadd.f32 %v768_v3, %v231_v5  ;;  %v252_v10 = vadd.f32 %v768_v3, %v232_v7  ;;  %v253_v14 = vadd.f32 %v768_v3, %v233_v13  ;;  %v254_v19 = vadd.f32 %v768_v3, %v234_v17 }
  0x1f   : > { %v255_v23 = vadd.f32 %v768_v3, %v235_v22  ;;  %v256_v28 = vadd.f32 %v768_v3, %v236_v26  ;;  %v257_v32 = vadd.f32 %v768_v3, %v237_v31  ;;  %v258_v37 = vadd.f32 %v768_v3, %v238_v35 }
  0x20   : > { %v267_v9 = vmax.f32 %v251_v6, 0.0  ;;  %v268_v12 = vmax.f32 %v252_v10, 0.0  ;;  %v269_v16 = vmax.f32 %v253_v14, 0.0  ;;  %v270_v21 = vmax.f32 %v254_v19, 0.0 }
  0x21   : > { %v271_v25 = vmax.f32 %v255_v23, 0.0  ;;  %v272_v30 = vmax.f32 %v256_v28, 0.0  ;;  %v273_v34 = vmax.f32 %v257_v32, 0.0  ;;  %v537_v38 = vunpack.c.l.bf16 %v554_v36 }
  0x22   : > { %283 = vxpose.xlu0.b32.start [1/16] %v267_v9, 128  ;;  %v274_v39 = vmax.f32 %v258_v37, 0.0  ;;  %v538_v42 = vunpack.c.h.bf16 %v554_v36  ;;  %v541_v47 = vunpack.c.l.bf16 %v555_v45  ;;  %v542_v51 = vunpack.c.h.bf16 %v555_v45 }
  0x23   : > { %v239_v40 = vmul.f32 %v762_v0, %v537_v38  ;;  %v545_v56 = vunpack.c.l.bf16 %v556_v54  ;;  %v546_v60 = vunpack.c.h.bf16 %v556_v54  ;;  %v549_v2 = vunpack.c.l.bf16 %v557_v63 }
  0x24   : > { %v240_v44 = vmul.f32 %v762_v0, %v538_v42  ;;  %v241_v49 = vmul.f32 %v762_v0, %v541_v47  ;;  %v242_v53 = vmul.f32 %v762_v0, %v542_v51  ;;  %v550_v7 = vunpack.c.h.bf16 %v557_v63 }
  0x25   : > { %v259_v41 = vadd.f32 %v768_v3, %v239_v40  ;;  %v243_v58 = vmul.f32 %v762_v0, %v545_v56  ;;  %v244_v62 = vmul.f32 %v762_v0, %v546_v60  ;;  %v245_v5 = vmul.f32 %v762_v0, %v549_v2 }
  0x26   : > { %v260_v46 = vadd.f32 %v768_v3, %v240_v44  ;;  %v261_v50 = vadd.f32 %v768_v3, %v241_v49  ;;  %v262_v55 = vadd.f32 %v768_v3, %v242_v53  ;;  %v246_v9 = vmul.f32 %v762_v0, %v550_v7 }
  0x27   : > { %v275_v43 = vmax.f32 %v259_v41, 0.0  ;;  %v263_v59 = vadd.f32 %v768_v3, %v243_v58  ;;  %v264_v1 = vadd.f32 %v768_v3, %v244_v62  ;;  %v265_v6 = vadd.f32 %v768_v3, %v245_v5 }
  0x28   : > { %v276_v48 = vmax.f32 %v260_v46, 0.0  ;;  %v277_v52 = vmax.f32 %v261_v50, 0.0  ;;  %v278_v57 = vmax.f32 %v262_v55, 0.0  ;;  %v266_v10 = vadd.f32 %v768_v3, %v246_v9 }
  0x29   : > { %v279_v61 = vmax.f32 %v263_v59, 0.0  ;;  %v280_v4 = vmax.f32 %v264_v1, 0.0  ;;  %v281_v8 = vmax.f32 %v265_v6, 0.0 }
  0x2a   : > { %284 = vxpose.xlu0.b32.cont [2/16] %v268_v12, 128  ;;  %v282_v11 = vmax.f32 %v266_v10, 0.0 }
  0x32   : > { %285 = vxpose.xlu0.b32.cont [3/16] %v269_v16, 128 }
  0x3a   : > { %286 = vxpose.xlu0.b32.cont [4/16] %v270_v21, 128 }
  0x42   : > { %287 = vxpose.xlu0.b32.cont [5/16] %v271_v25, 128 }
  0x4a   : > { %288 = vxpose.xlu0.b32.cont [6/16] %v272_v30, 128 }
  0x52   : > { %289 = vxpose.xlu0.b32.cont [7/16] %v273_v34, 128 }
  0x5a   : > { %290 = vxpose.xlu0.b32.cont [8/16] %v274_v39, 128 }
  0x62   : > { %291 = vxpose.xlu0.b32.cont [9/16] %v275_v43, 128 }
  0x6a   : > { %292 = vxpose.xlu0.b32.cont [10/16] %v276_v48, 128 }
  0x72   : > { %293 = vxpose.xlu0.b32.cont [11/16] %v277_v52, 128 }
  0x7a   : > { %294 = vxpose.xlu0.b32.cont [12/16] %v278_v57, 128 }
  0x82   : > { %295 = vxpose.xlu0.b32.cont [13/16] %v279_v61, 128 }
  0x8a   : > { %296 = vxpose.xlu0.b32.cont [14/16] %v280_v4, 128 }
  0x92   : > { %297 = vxpose.xlu0.b32.cont [15/16] %v281_v8, 128 }
  0x9a   : > { %298 = vxpose.xlu0.b32.end [16/16] %v282_v11, 128 }
  0xc6   : > { %v299_v12 = vpop.trf.xlu0 }
  0xc7   : > { %315 = vst [vmem:[%s810_s25] sm:$0xff] %v299_v12 }
  0xce   : > { %v300_v0 = vpop.trf.xlu0  ;;  %v400_v26 = vld [vmem:[%s810_s25] sm:$0xff] (%p738_p5) }
  0xcf   : > { %316 = vst [vmem:[%s810_s25 + $0x8] sm:$0xff] %v300_v0 }
  0xd0   : > { %401 = vst [vmem:[%s341_s23] sm:$0xff] (%p738_p5), %v400_v26 }
  0xd6   : > { %v301_v3 = vpop.trf.xlu0  ;;  %v402_v27 = vld [vmem:[%s810_s25 + $0x8] sm:$0xff] (%p738_p5) }
  0xd7   : > { %317 = vst [vmem:[%s810_s25 + $0x10] sm:$0xff] %v301_v3 }
  0xd8   : > { %403 = vst [vmem:[%s341_s23 + $0x10] sm:$0xff] (%p738_p5), %v402_v27 }
  0xde   : > { %v302_v13 = vpop.trf.xlu0  ;;  %v404_v28 = vld [vmem:[%s810_s25 + $0x10] sm:$0xff] (%p738_p5) }
  0xdf   : > { %318 = vst [vmem:[%s810_s25 + $0x18] sm:$0xff] %v302_v13 }
  0xe0   : > { %405 = vst [vmem:[%s341_s23 + $0x20] sm:$0xff] (%p738_p5), %v404_v28 }
  0xe6   : > { %v303_v14 = vpop.trf.xlu0  ;;  %v406_v29 = vld [vmem:[%s810_s25 + $0x18] sm:$0xff] (%p738_p5) }
  0xe7   : > { %319 = vst [vmem:[%s810_s25 + $0x20] sm:$0xff] %v303_v14 }
  0xe8   : > { %407 = vst [vmem:[%s341_s23 + $0x30] sm:$0xff] (%p738_p5), %v406_v29 }
  0xee   : > { %v304_v15 = vpop.trf.xlu0  ;;  %v408_v30 = vld [vmem:[%s810_s25 + $0x20] sm:$0xff] (%p738_p5) }
  0xef   : > { %320 = vst [vmem:[%s810_s25 + $0x28] sm:$0xff] %v304_v15 }
  0xf0   : > { %409 = vst [vmem:[%s341_s23 + $0x40] sm:$0xff] (%p738_p5), %v408_v30 }
  0xf6   : > { %v305_v16 = vpop.trf.xlu0  ;;  %v410_v31 = vld [vmem:[%s810_s25 + $0x28] sm:$0xff] (%p738_p5) }
  0xf7   : > { %321 = vst [vmem:[%s810_s25 + $0x30] sm:$0xff] %v305_v16 }
  0xf8   : > { %411 = vst [vmem:[%s341_s23 + $0x50] sm:$0xff] (%p738_p5), %v410_v31 }
  0xfe   : > { %v306_v17 = vpop.trf.xlu0  ;;  %v412_v32 = vld [vmem:[%s810_s25 + $0x30] sm:$0xff] (%p738_p5) }
  0xff   : > { %322 = vst [vmem:[%s810_s25 + $0x38] sm:$0xff] %v306_v17 }
 0x100   : > { %413 = vst [vmem:[%s341_s23 + $0x60] sm:$0xff] (%p738_p5), %v412_v32 }
 0x106   : > { %v307_v18 = vpop.trf.xlu0  ;;  %v414_v33 = vld [vmem:[%s810_s25 + $0x38] sm:$0xff] (%p738_p5) }
 0x107   : > { %323 = vst [vmem:[%s810_s25 + $0x40] sm:$0xff] %v307_v18 }
 0x108   : > { %415 = vst [vmem:[%s341_s23 + $0x70] sm:$0xff] (%p738_p5), %v414_v33 }
 0x10e   : > { %v308_v19 = vpop.trf.xlu0  ;;  %v416_v34 = vld [vmem:[%s810_s25 + $0x40] sm:$0xff] (%p738_p5) }
 0x10f   : > { %324 = vst [vmem:[%s810_s25 + $0x48] sm:$0xff] %v308_v19 }
 0x110   : > { %417 = vst [vmem:[%s341_s23 + $0x80] sm:$0xff] (%p738_p5), %v416_v34 }
 0x116   : > { %v309_v20 = vpop.trf.xlu0  ;;  %v418_v35 = vld [vmem:[%s810_s25 + $0x48] sm:$0xff] (%p738_p5) }
 0x117   : > { %325 = vst [vmem:[%s810_s25 + $0x50] sm:$0xff] %v309_v20 }
 0x118   : > { %419 = vst [vmem:[%s341_s23 + $0x90] sm:$0xff] (%p738_p5), %v418_v35 }
 0x11e   : > { %v310_v21 = vpop.trf.xlu0  ;;  %v420_v36 = vld [vmem:[%s810_s25 + $0x50] sm:$0xff] (%p738_p5) }
 0x11f   : > { %326 = vst [vmem:[%s810_s25 + $0x58] sm:$0xff] %v310_v21 }
 0x120   : > { %421 = vst [vmem:[%s341_s23 + $0xa0] sm:$0xff] (%p738_p5), %v420_v36 }
 0x126   : > { %v311_v22 = vpop.trf.xlu0  ;;  %v422_v37 = vld [vmem:[%s810_s25 + $0x58] sm:$0xff] (%p738_p5) }
 0x127   : > { %327 = vst [vmem:[%s810_s25 + $0x60] sm:$0xff] %v311_v22 }
 0x128   : > { %423 = vst [vmem:[%s341_s23 + $0xb0] sm:$0xff] (%p738_p5), %v422_v37 }
 0x12e   : > { %v312_v23 = vpop.trf.xlu0  ;;  %v424_v38 = vld [vmem:[%s810_s25 + $0x60] sm:$0xff] (%p738_p5) }
 0x12f   : > { %328 = vst [vmem:[%s810_s25 + $0x68] sm:$0xff] %v312_v23 }
 0x130   : > { %425 = vst [vmem:[%s341_s23 + $0xc0] sm:$0xff] (%p738_p5), %v424_v38 }
 0x136   : > { %v313_v24 = vpop.trf.xlu0  ;;  %v426_v39 = vld [vmem:[%s810_s25 + $0x68] sm:$0xff] (%p738_p5) }
 0x137   : > { %329 = vst [vmem:[%s810_s25 + $0x70] sm:$0xff] %v313_v24 }
 0x138   : > { %427 = vst [vmem:[%s341_s23 + $0xd0] sm:$0xff] (%p738_p5), %v426_v39 }
 0x13b   : > { %337 = sbr.rel (!%p738_p5) target bundleno = 328 (0x148), region = 36 }
 0x13e   : > { %v314_v25 = vpop.trf.xlu0  ;;  %v428_v40 = vld [vmem:[%s810_s25 + $0x70] sm:$0xff] (%p738_p5) }
 0x13f   : > { %330 = vst [vmem:[%s810_s25 + $0x78] sm:$0xff] %v314_v25 }
 0x140   : > { %429 = vst [vmem:[%s341_s23 + $0xe0] sm:$0xff] %v428_v40 }
 0x146   : > { %v430_v41 = vld [vmem:[%s810_s25 + $0x78] sm:$0xff] }
 0x147   : > { %431 = vst [vmem:[%s341_s23 + $0xf0] sm:$0xff] %v430_v41 }
 0x148 PF: > { %s13_s18 = sadd.s32 1, %s670_s18   ;;  %s877_s12 = smov %s650_s13 }
 0x149   : > { %p10_p11 = scmp.ge.s32.totalorder %s13_s18, 6   ;;  %s878_s13 = smov %s749_s27 }
 0x14a   : > { %s879_s14 = smov %s662_s16  ;;  %s880_s15 = smov %s666_s17 }
 0x14b   : > { %s881_s16 = smov %s884_s19  ;;  %s882_s17 = smov %s888_s20 }
 0x14c   :  { %12 = sbr.rel (!%p10_p11) target bundleno = 4 (0x4), region = 100 }

// kernel: conv_block_forward.2
= control target key start
LH: loop header
LB: loop body
LE: loop exit
PB: predicated region body
PF: predicated region fallthrough
CT: control target
= control target key end

     0   :  { %s1922_s12 = smov 0   ;;  %s1924_s13 = smov 0   ;;  %s2565_s0 = inlined_call_operand.vmem [shape: bf16[2,2,10,18,8], index: 0, kind: input, shape index: {}]   ;;  %s2566_s1 = inlined_call_operand.vmem [shape: bf16[9,8,128], index: 1, kind: input, shape index: {}]   ;;  %s2567_s2 = inlined_call_operand.vmem [shape: bf16[2,256,128], index: 2, kind: output, shape index: {0}]   ;;  %s2568_s3 = inlined_call_operand.vmem [shape: f32[2,2,2,128], index: 3, kind: output, shape index: {1}]  }
   0x1   :  { %s1926_s14 = smov 0   ;;  %s1928_s15 = smov 0  }
   0x2   :  { %s1930_s16 = smov 0  }
   0x3 LB: > { %s23_s17 = sadd.s32 1, %s1892_s14  ;;  %s26_s18 = sadd.s32 1, %s1896_s15  ;;  %s1900_s16 = sphi %s1930_s16, %s14_s16   ;;  %s1896_s15 = sphi %s1928_s15, %s2576_s15   ;;  %s1892_s14 = sphi %s1926_s14, %s2575_s14   ;;  %s1888_s13 = sphi %s1924_s13, %s2574_s13   ;;  %s1884_s12 = sphi %s1922_s12, %s2573_s12  }
   0x4   : > { %p24_p0 = scmp.ge.s32.totalorder %s23_s17, 2  ;;  %p1621_p1 = scmp.ge.s32.totalorder %s1900_s16, 1 }
   0x5   : > { %p162_p2 = scmp.lt.s32.totalorder %s1900_s16, 5 }
   0x6   : > { %s2578_s17 = smov (%p24_p0, %s23_s17), 0  ;;  %s2580_s18 = smov (!%p24_p0, %s26_s18), %s1896_s15 }
   0x7   : > { %p163_p3 = pnand %p1621_p1, %p162_p2  ;;  %p28_p4 = scmp.ge.s32.totalorder %s2580_s18, 2 }
   0x8   : > { %p202_p5 = scmp.lt.s32.totalorder (!%p163_p3), %s1888_s13, 1  ;;  %p204_p6 = scmp.lt.s32.totalorder (!%p163_p3), %s1884_s12, 1 }
   0x9   : > { %s2582_s18 = smov (%p28_p4, %s2580_s18), 0  ;;  %166 = sbr.rel (%p163_p3) target bundleno = 481 (0x1e1), region = 28 }
   0xa   : > { %s1623_s26 = sshll.u32 (!%p163_p3), %s1884_s12, 4 }
   0xb   : > { %p214_p7 = scmp.lt.s32.totalorder (!%p163_p3), %s1623_s26, 31 }
   0xe   : > { %v1628_v0 = vld [vmem:[%s2566_s1 + $0x4] sm:$0xf]  ;;  %vm507_vm0 = vcmask 1043456   ;;  %s2584_s13 = smov (!%p202_p5, %s1888_s13), 1  ;;  %v1685_v2 = vld [vmem:[%s2566_s1 + $0x8] sm:$0xf] }
   0xf   : > { %v509_v1 = vsel %vm507_vm0, %v1628_v0, 0  ;;  %s1965_s23 = scalar_select %p204_p6, %s1884_s12, 1  ;;  %v794_v3 = vsel %vm507_vm0, %v1685_v2, 0  ;;  %v1694_v4 = vld [vmem:[%s2566_s1 + $0xc] sm:$0xf]  ;;  %vm482_vm3 = vcmask 64512  }
  0x10   : > { %1817 = vmatpush.bf16.msra.mxu1 %v509_v1  ;;  %1818 = vmatpush.bf16.msra.mxu2 %v509_v1  ;;  %s1821_s24 = smul.u32 60, %s2584_s13  ;;  %v260_v5 = vld [vmem:[%s2566_s1] sm:$0xf]  ;;  %v1707_v6 = vld [vmem:[%s2566_s1 + $0x10] sm:$0xf]  ;;  %v872_v7 = vsel %vm507_vm0, %v1694_v4, 0 }
  0x11   : > { %1819 = vmatpush.bf16.msra.mxu3 %v509_v1  ;;  %518 = vmatpush.bf16.msra.mxu0 %v509_v1  ;;  %s1820_s25 = smul.u32 30, %s1965_s23  ;;  %v625_v8 = vsel %vm507_vm0, %v260_v5, 0  ;;  %v972_v9 = vsel %vm507_vm0, %v1707_v6, 0  ;;  %vm261_vm1 = vsmask.f32 3328  ;;  %vm684_vm5 = vcmask 1042432  }
  0x12   : > { %vm262_vm2 = vsmask.f32 7440  ;;  %vm685_vm6 = vcmask 1046532   ;;  %s2586_s26 = smov (!%p214_p7, %s1623_s26), 31  ;;  %s1624_s27 = sshll.u32 %s2584_s13, 5 }
  0x13   : > { %s208_s5 = sadd.s32 %s1821_s24, %s1820_s25  ;;  %vm2023_vm4 = vmor %vm261_vm1, %vm262_vm2  ;;  %s217_s28 = sadd.s32 %s1624_s27, %s2586_s26 }
  0x14   : > { %803 = vmatpush.bf16.msrb.mxu2 %v794_v3  ;;  %s1622_s6 = sshll.u32 %s208_s5, 2  ;;  %634 = vmatpush.bf16.msrb.mxu1 %v625_v8  ;;  %vm2177_vm7 = vmor %vm684_vm5, %vm685_vm6  ;;  %s1625_s12 = sshll.u32 %s217_s28, 2 }
  0x15   : > { %881 = vmatpush.bf16.msrb.mxu3 %v872_v7  ;;  %s1985_s9 = scalar_lea.vmem %s2565_s0, %s1622_s6  ;;  %981 = vmatpush.bf16.msrb.mxu0 %v972_v9  ;;  %s2522_s4 = scalar_lea.vmem %s2567_s2, %s1625_s12 }
  0x16   : > { %v1988_v10 = vld [vmem:[%s1985_s9 + $0x18] sm:$0xf]  ;;  %v1991_v11 = vld [vmem:[%s1985_s9 + $0x1c] sm:$0xf]  ;;  %v1994_v12 = vld [vmem:[%s1985_s9 + $0x20] sm:$0x1] }
  0x17   : > { %v313_v13 = vshrl.u32 %v1988_v10, 16  ;;  %v316_v14 = vshll.u32 %v1988_v10, 16  ;;  %v322_v15 = vshll.u32 %v1991_v11, 16  ;;  %v326_v16 = vshrl.u32 %v1991_v11, 16  ;;  %v2001_v17 = vld [vmem:[%s1985_s9 + $0x30] sm:$0xf] }
  0x18   : > { %v332_v18 = vshll.u32 %v1994_v12, 16  ;;  %v2005_v19 = vld [vmem:[%s1985_s9 + $0x34] sm:$0xf]  ;;  %v2008_v20 = vld [vmem:[%s1985_s9 + $0x38] sm:$0x1]  ;;  %v361_v21 = vshrl.u32 %v2001_v17, 16 }
  0x19   : > { %v315_v22 = vrot.slane %v313_v13, 4  ;;  %v318_v23 = vrot.slane %v316_v14, 5  ;;  %v324_v24 = vrot.slane %v322_v15, 5  ;;  %v328_v25 = vrot.slane %v326_v16, 4  ;;  %v2012_v26 = vld [vmem:[%s1985_s9 + $0x48] sm:$0xf] }
  0x1a   : > { %v334_v27 = vrot.slane %v332_v18, 5  ;;  %v363_v28 = vrot.slane %v361_v21, 4  ;;  %v364_v29 = vshll.u32 %v2001_v17, 16  ;;  %v370_v30 = vshll.u32 %v2005_v19, 16  ;;  %v2019_v35 = vld [vmem:[%s1985_s9 + $0x4c] sm:$0xf] }
  0x1b   : > { %v319_v31 = vor.u32 %v318_v23, %v315_v22  ;;  %v329_v32 = vor.u32 %v328_v25, %v324_v24  ;;  %v374_v33 = vshrl.u32 %v2005_v19, 16  ;;  %v380_v34 = vshll.u32 %v2008_v20, 16  ;;  %v2030_v46 = vld [vmem:[%s1985_s9 + $0x50] sm:$0x1]  ;;  %v2039_v54 = vld [vmem:[%s1985_s9] sm:$0xf] }
  0x1c   : > { %v366_v37 = vrot.slane %v364_v29, 5  ;;  %v372_v38 = vrot.slane %v370_v30, 5  ;;  %v409_v39 = vshrl.u32 %v2012_v26, 16  ;;  %v412_v40 = vshll.u32 %v2012_v26, 16  ;;  %v2047_v2 = vld [vmem:[%s1985_s9 + $0x4] sm:$0xf] }
  0x1d   : > { %v320_v41 = vrot.slane %v319_v31, 4  ;;  %v330_v42 = vrot.slane %v329_v32, 4  ;;  %v376_v43 = vrot.slane %v374_v33, 4  ;;  %v382_v44 = vrot.slane %v380_v34, 5  ;;  %v2053_v8 = vld [vmem:[%s1985_s9 + $0x8] sm:$0x1] }
  0x1e   : > { %v367_v45 = vor.u32 %v366_v37, %v363_v28  ;;  %v411_v47 = vrot.slane %v409_v39, 4  ;;  %v414_v48 = vrot.slane %v412_v40, 5  ;;  %v418_v49 = vshll.u32 %v2019_v35, 16  ;;  %v2061_v16 = vld [vmem:[%s1985_s9 + $0x24] sm:$0xf]  ;;  %s1626_s5 = sshll.u32 %s2584_s13, 1 }
  0x1f   : > { %v325_v50 = vsel %vm2023_vm4, %v320_v41, %v324_v24  ;;  %v335_v51 = vsel %vm2023_vm4, %v330_v42, %v334_v27  ;;  %v377_v52 = vor.u32 %v376_v43, %v372_v38  ;;  %v422_v53 = vshrl.u32 %v2019_v35, 16  ;;  %v2070_v29 = vld [vmem:[%s1985_s9 + $0x28] sm:$0xf]  ;;  %v2075_v33 = vld [vmem:[%s1985_s9 + $0x2c] sm:$0x1]  ;;  %s226_s6 = sadd.s32 %s1626_s5, %s1965_s23 }
  0x20   : > { %v462_v55 = vunpack.c.l.b16 %v325_v50  ;;  %v463_v56 = vunpack.c.l.b16 %v335_v51  ;;  %v368_v57 = vrot.slane %v367_v45, 4  ;;  %v415_v58 = vor.u32 %v414_v48, %v411_v47  ;;  %v2082_v41 = vld [vmem:[%s1985_s9 + $0x3c] sm:$0xf]  ;;  %s1627_s7 = sshll.u32 %s226_s6, 1 }
  0x21   : > { %v378_v59 = vrot.slane %v377_v52, 4  ;;  %v420_v60 = vrot.slane %v418_v49, 5  ;;  %v424_v61 = vrot.slane %v422_v53, 4  ;;  %v428_v62 = vshll.u32 %v2030_v46, 16  ;;  %s228_s10 = scalar_lea.vmem %s2568_s3, %s1627_s7 }
  0x22   : > { %v2042_v63 = vpack.c.b16 %v463_v56, %v462_v55  ;;  %v373_v0 = vsel %vm2023_vm4, %v368_v57, %v372_v38  ;;  %v416_v1 = vrot.slane %v415_v58, 4  ;;  %v265_v3 = vshrl.u32 %v2039_v54, 16  ;;  %v2090_v55 = vld [vmem:[%s1985_s9 + $0x40] sm:$0xf] }
  0x23   : > { %v383_v4 = vsel %vm2023_vm4, %v378_v59, %v382_v44  ;;  %v466_v5 = vunpack.c.l.b16 %v373_v0  ;;  %v425_v6 = vor.u32 %v424_v61, %v420_v60  ;;  %v430_v7 = vrot.slane %v428_v62, 5  ;;  %v2102_v62 = vld [vmem:[%s1985_s9 + $0x54] sm:$0xf] }
  0x24   : > { %1631 = vmatmul.msk.bf16.vlgmr.msra.gmra.mxu1 %vm482_vm3, %v2042_v63  ;;  %v467_v9 = vunpack.c.l.b16 %v383_v4  ;;  %v421_v13 = vsel %vm2023_vm4, %v416_v1, %v420_v60  ;;  %v267_v14 = vrot.slane %v265_v3, 4  ;;  %v268_v15 = vshll.u32 %v2039_v54, 16  ;;  %v2098_v60 = vld [vmem:[%s1985_s9 + $0x44] sm:$0x1] }
  0x25   : > { %v426_v18 = vrot.slane %v425_v6, 4  ;;  %v470_v21 = vunpack.c.l.b16 %v421_v13  ;;  %v274_v22 = vshll.u32 %v2047_v2, 16  ;;  %v278_v23 = vshrl.u32 %v2047_v2, 16 }
  0x26   : > { %v2065_v24 = vpack.c.b16 %v467_v9, %v466_v5  ;;  %v270_v25 = vrot.slane %v268_v15, 5  ;;  %v284_v27 = vshll.u32 %v2053_v8, 16  ;;  %v692_v28 = vrot.slane %v2053_v8, 5 }
  0x27   : > { %v431_v30 = vsel %vm2023_vm4, %v426_v18, %v430_v7  ;;  %v276_v31 = vrot.slane %v274_v22, 5  ;;  %v280_v32 = vrot.slane %v278_v23, 4  ;;  %v337_v34 = vshrl.u32 %v2061_v16, 16 }
  0x28   : > { %1633 = vmatmul.msk.bf16.vlgmr.msra.gmra.mxu2 %vm482_vm3, %v2065_v24  ;;  %v471_v37 = vunpack.c.l.b16 %v431_v30  ;;  %v271_v38 = vor.u32 %v270_v25, %v267_v14  ;;  %v286_v39 = vrot.slane %v284_v27, 5  ;;  %v340_v40 = vshll.u32 %v2061_v16, 16  ;;  %v2113_v27 = vld [vmem:[%s1985_s9 + $0x58] sm:$0xf]  ;;  %v2116_v30 = vld [vmem:[%s1985_s9 + $0x5c] sm:$0x1] }
  0x29   : > { %v281_v42 = vor.u32 %v280_v32, %v276_v31  ;;  %v339_v43 = vrot.slane %v337_v34, 4  ;;  %v346_v44 = vshll.u32 %v2070_v29, 16  ;;  %v350_v45 = vshrl.u32 %v2070_v29, 16 }
  0x2a   : > { %v2086_v47 = vpack.c.b16 %v471_v37, %v470_v21  ;;  %v272_v48 = vrot.slane %v271_v38, 4  ;;  %v342_v49 = vrot.slane %v340_v40, 5  ;;  %v356_v50 = vshll.u32 %v2075_v33, 16  ;;  %v2121_v38 = vld [vmem:[%s1985_s9 + $0xc] sm:$0xf] }
  0x2b   : > { %v282_v51 = vrot.slane %v281_v42, 4  ;;  %v348_v52 = vrot.slane %v346_v44, 5  ;;  %v352_v53 = vrot.slane %v350_v45, 4  ;;  %v385_v56 = vshrl.u32 %v2082_v41, 16 }
  0x2c   : > { %1635 = vmatmul.msk.bf16.vlgmr.msra.gmra.mxu3 %vm482_vm3, %v2086_v47  ;;  %v277_v57 = vsel %vm2023_vm4, %v272_v48, %v276_v31  ;;  %v343_v58 = vor.u32 %v342_v49, %v339_v43  ;;  %v358_v59 = vrot.slane %v356_v50, 5  ;;  %v388_v61 = vshll.u32 %v2082_v41, 16 }
  0x2d   : > { %v287_v0 = vsel %vm2023_vm4, %v282_v51, %v286_v39  ;;  %v458_v1 = vunpack.c.l.b16 %v277_v57  ;;  %v353_v3 = vor.u32 %v352_v53, %v348_v52  ;;  %v387_v4 = vrot.slane %v385_v56, 4  ;;  %v2133_v53 = vld [vmem:[%s1985_s9 + $0x10] sm:$0xf] }
  0x2e   : > { %v459_v5 = vunpack.c.l.b16 %v287_v0  ;;  %v344_v6 = vrot.slane %v343_v58, 4  ;;  %v390_v7 = vrot.slane %v388_v61, 5  ;;  %v394_v9 = vshll.u32 %v2090_v55, 16  ;;  %v2137_v0 = vld [vmem:[%s1985_s9 + $0x14] sm:$0x1] }
  0x2f   : > { %v354_v13 = vrot.slane %v353_v3, 4  ;;  %v398_v14 = vshrl.u32 %v2090_v55, 16  ;;  %v404_v15 = vshll.u32 %v2098_v60, 16  ;;  %v433_v18 = vshrl.u32 %v2102_v62, 16 }
  0x30   : > { %v474_v21 = vpack.c.b16 %v459_v5, %v458_v1  ;;  %v349_v22 = vsel %vm2023_vm4, %v344_v6, %v348_v52  ;;  %v391_v23 = vor.u32 %v390_v7, %v387_v4  ;;  %v396_v25 = vrot.slane %v394_v9, 5 }
  0x31   : > { %v359_v31 = vsel %vm2023_vm4, %v354_v13, %v358_v59  ;;  %v464_v32 = vunpack.c.l.b16 %v349_v22  ;;  %v400_v34 = vrot.slane %v398_v14, 4  ;;  %v406_v37 = vrot.slane %v404_v15, 5 }
  0x32   : > { %1629 = vmatmul.msk.bf16.vlgmr.msra.gmra.mxu0 %vm482_vm3, %v474_v21  ;;  %v465_v39 = vunpack.c.l.b16 %v359_v31  ;;  %v392_v40 = vrot.slane %v391_v23, 4  ;;  %v435_v42 = vrot.slane %v433_v18, 4  ;;  %v436_v43 = vshll.u32 %v2102_v62, 16  ;;  %v1726_v31 = vld [vmem:[%s2566_s1 + $0x18] sm:$0xf] }
  0x33   : > { %v401_v44 = vor.u32 %v400_v34, %v396_v25  ;;  %v442_v45 = vshll.u32 %v2113_v27, 16  ;;  %v446_v48 = vshrl.u32 %v2113_v27, 16  ;;  %v452_v49 = vshll.u32 %v2116_v30, 16 }
  0x34   : > { %v2128_v50 = vpack.c.b16 %v465_v39, %v464_v32  ;;  %v397_v51 = vsel %vm2023_vm4, %v392_v40, %v396_v25  ;;  %v438_v52 = vrot.slane %v436_v43, 5  ;;  %v289_v56 = vshrl.u32 %v2121_v38, 16  ;;  %v1739_v40 = vld [vmem:[%s2566_s1 + $0x1c] sm:$0xf] }
  0x35   : > { %v402_v57 = vrot.slane %v401_v44, 4  ;;  %v468_v58 = vunpack.c.l.b16 %v397_v51  ;;  %v444_v59 = vrot.slane %v442_v45, 5  ;;  %v448_v61 = vrot.slane %v446_v48, 4 }
  0x36   : > { %1632 = vmatmul.msk.bf16.gmra.mxu1 %vm482_vm3, %v2128_v50  ;;  %v439_v1 = vor.u32 %v438_v52, %v435_v42  ;;  %v454_v3 = vrot.slane %v452_v49, 5  ;;  %v291_v4 = vrot.slane %v289_v56, 4  ;;  %v292_v5 = vshll.u32 %v2121_v38, 16  ;;  %v1717_v42 = vld [vmem:[%s2566_s1 + $0x14] sm:$0xf] }
  0x37   : > { %v407_v6 = vsel %vm2023_vm4, %v402_v57, %v406_v37  ;;  %v449_v7 = vor.u32 %v448_v61, %v444_v59  ;;  %v298_v9 = vshll.u32 %v2133_v53, 16  ;;  %v302_v13 = vshrl.u32 %v2133_v53, 16  ;;  %v1749_v56 = vld [vmem:[%s2566_s1 + $0x20] sm:$0xf] }
  0x38   : > { %v469_v14 = vunpack.c.l.b16 %v407_v6  ;;  %v440_v15 = vrot.slane %v439_v1, 4  ;;  %v294_v18 = vrot.slane %v292_v5, 5  ;;  %v308_v21 = vshll.u32 %v2137_v0, 16 }
  0x39   : > { %v450_v22 = vrot.slane %v449_v7, 4  ;;  %v300_v23 = vrot.slane %v298_v9, 5  ;;  %v304_v25 = vrot.slane %v302_v13, 4  ;;  %v1677_v51 = vrot.slane %v2039_v54, 9 }
  0x3a   : > { %v2150_v32 = vpack.c.b16 %v469_v14, %v468_v58  ;;  %v445_v34 = vsel %vm2023_vm4, %v440_v15, %v444_v59  ;;  %v295_v37 = vor.u32 %v294_v18, %v291_v4  ;;  %v310_v39 = vrot.slane %v308_v21, 5  ;;  %v1760_v15 = vld [vmem:[%s1985_s9] sm:$0xff] }
  0x3b   : > { %v455_v43 = vsel %vm2023_vm4, %v450_v22, %v454_v3  ;;  %v472_v44 = vunpack.c.l.b16 %v445_v34  ;;  %v305_v45 = vor.u32 %v304_v25, %v300_v23  ;;  %v689_v52 = vrot.slane %v2047_v2, 5 }
  0x3c   : > { %1634 = vmatmul.msk.bf16.gmra.mxu2 %vm482_vm3, %v2150_v32  ;;  %v473_v48 = vunpack.c.l.b16 %v455_v43  ;;  %v296_v49 = vrot.slane %v295_v37, 4  ;;  %v1134_v58 = vsel %vm507_vm0, %v1726_v31, 0  ;;  %v1234_v59 = vsel %vm507_vm0, %v1739_v40, 0 }
  0x3d   : > { %v306_v57 = vrot.slane %v305_v45, 4  ;;  %v1056_v61 = vsel %vm507_vm0, %v1717_v42, 0  ;;  %v691_v2 = vrot.slane %v689_v52, 4  ;;  %1143 = vmatpush.bf16.msra.mxu2 %v1134_v58  ;;  %1243 = vmatpush.bf16.msra.mxu3 %v1234_v59  ;;  %v1318_v6 = vsel %vm507_vm0, %v1749_v56, 0  ;;  %v1761_v42 = vld [vmem:[%s1985_s9 + $0xc] sm:$0xff] }
  0x3e   : > { %v2172_v1 = vpack.c.b16 %v473_v48, %v472_v44  ;;  %v301_v3 = vsel %vm2023_vm4, %v296_v49, %v300_v23  ;;  %1065 = vmatpush.bf16.msra.mxu1 %v1056_v61  ;;  %1327 = vmatpush.bf16.msra.mxu0 %v1318_v6  ;;  %v690_v9 = vsel %vm2177_vm7, %v1677_v51, %v689_v52  ;;  %v1679_v22 = vrot.slane %v1988_v10, 9 }
  0x3f   : > { %v311_v4 = vsel %vm2023_vm4, %v306_v57, %v310_v39  ;;  %v460_v5 = vunpack.c.l.b16 %v301_v3  ;;  %v693_v13 = vsel %vm2177_vm7, %v691_v2, %v692_v28  ;;  %v745_v18 = vunpack.c.l.b16 %v690_v9  ;;  %v2253_v3 = vld [vmem:[%s1985_s9 + $0x30] sm:$0xff] }
  0x40   : > { %1636 = vmatmul.msk.bf16.gmra.mxu3 %vm482_vm3, %v2172_v1  ;;  %v461_v7 = vunpack.c.l.b16 %v311_v4  ;;  %v746_v21 = vunpack.c.l.b16 %v693_v13  ;;  %v703_v23 = vrot.slane %v1991_v11, 5  ;;  %v706_v25 = vrot.slane %v1994_v12, 5  ;;  %v2273_v13 = vld [vmem:[%s1985_s9 + $0x3c] sm:$0xff] }
  0x41   : > { %v696_v34 = vrot.slane %v2133_v53, 5  ;;  %v1678_v10 = vrot.slane %v2121_v38, 9  ;;  %v699_v12 = vrot.slane %v2137_v0, 5  ;;  %v1680_v38 = vrot.slane %v2061_v16, 9  ;;  %v2228_v16 = vld [vmem:[%s1985_s9 + $0x18] sm:$0xff] }
  0x42   : > { %v475_v14 = vpack.c.b16 %v461_v7, %v460_v5  ;;  %v761_v31 = vpack.c.b16 %v746_v21, %v745_v18  ;;  %v704_v8 = vsel %vm2177_vm7, %v1679_v22, %v703_v23  ;;  %v705_v28 = vrot.slane %v703_v23, 4 }
  0x43   : > { %v749_v37 = vunpack.c.l.b16 %v704_v8  ;;  %v698_v11 = vrot.slane %v696_v34, 4  ;;  %v697_v53 = vsel %vm2177_vm7, %v1678_v10, %v696_v34  ;;  %v710_v0 = vrot.slane %v2070_v29, 5 }
  0x44   : > { %1630 = vmatmul.msk.bf16.gmra.mxu0 %vm482_vm3, %v475_v14  ;;  %v707_v39 = vsel %vm2177_vm7, %v705_v28, %v706_v25  ;;  %v747_v45 = vunpack.c.l.b16 %v697_v53  ;;  %v713_v49 = vrot.slane %v2075_v33, 5  ;;  %v2241_v33 = vld [vmem:[%s1985_s9 + $0x24] sm:$0xff]  ;;  %v717_v61 = vrot.slane %v2005_v19, 5 }
  0x45   : > { %v750_v40 = vunpack.c.l.b16 %v707_v39  ;;  %v700_v44 = vsel %vm2177_vm7, %v698_v11, %v699_v12  ;;  %v711_v52 = vsel %vm2177_vm7, %v1680_v38, %v710_v0  ;;  %v712_v56 = vrot.slane %v710_v0, 4  ;;  %v2293_v25 = vld [vmem:[%s1985_s9 + $0x48] sm:$0xff]  ;;  %v2329_v38 = vld [vmem:[%s1985_s9 + $0x54] sm:$0xff] }
  0x46   : > { %1669 = vmatmul.msk.bf16.vlgmr.msrb.gmra.mxu1 %vm482_vm3, %v1760_v15  ;;  %v748_v48 = vunpack.c.l.b16 %v700_v44  ;;  %v751_v57 = vunpack.c.l.b16 %v711_v52  ;;  %v1681_v2 = vrot.slane %v2001_v17, 9  ;;  %v719_v4 = vrot.slane %v717_v61, 4 }
  0x47   : > { %v2207_v43 = vpack.c.b16 %v750_v40, %v749_v37  ;;  %v714_v58 = vsel %vm2177_vm7, %v712_v56, %v713_v49  ;;  %v720_v5 = vrot.slane %v2008_v20, 5  ;;  %v724_v20 = vrot.slane %v2090_v55, 5  ;;  %v2308_v40 = vld [vmem:[%s1985_s9 + $0x60] sm:$0xf] }
  0x48   : > { %v2219_v51 = vpack.c.b16 %v748_v48, %v747_v45  ;;  %v752_v59 = vunpack.c.l.b16 %v714_v58  ;;  %v718_v6 = vsel %vm2177_vm7, %v1681_v2, %v717_v61  ;;  %v727_v18 = vrot.slane %v2098_v60, 5  ;;  %v2334_v61 = vld [vmem:[%s1985_s9 + $0x68] sm:$0x1] }
  0x49   : > { %v721_v19 = vsel %vm2177_vm7, %v719_v4, %v720_v5  ;;  %v753_v7 = vunpack.c.l.b16 %v718_v6  ;;  %v726_v15 = vrot.slane %v724_v20, 4  ;;  %v731_v60 = vrot.slane %v2019_v35, 5 }
  0x4a   : > { %v2230_v29 = vpack.c.b16 %v752_v59, %v751_v57  ;;  %v754_v9 = vunpack.c.l.b16 %v721_v19  ;;  %v734_v28 = vrot.slane %v2030_v46, 5  ;;  %v2311_v46 = vld [vmem:[%s1985_s9 + $0x64] sm:$0xf]  ;;  %v940_v10 = vshrl.u32 %v2308_v40, 16 }
  0x4b   : > { %v728_v55 = vsel %vm2177_vm7, %v726_v15, %v727_v18  ;;  %v733_v8 = vrot.slane %v731_v60, 4  ;;  %v943_v11 = vshll.u32 %v2308_v40, 16  ;;  %v949_v12 = vshll.u32 %v2311_v46, 16 }
  0x4c   : > { %1686 = vmatmul.msk.bf16.vlgmr.msrb.gmra.mxu2 %vm482_vm3, %v761_v31  ;;  %v2267_v17 = vpack.c.b16 %v754_v9, %v753_v7  ;;  %v756_v23 = vunpack.c.l.b16 %v728_v55  ;;  %v1683_v31 = vrot.slane %v2012_v26, 9  ;;  %v738_v44 = vrot.slane %v2113_v27, 5 }
  0x4d   : > { %v735_v35 = vsel %vm2177_vm7, %v733_v8, %v734_v28  ;;  %v953_v45 = vshrl.u32 %v2311_v46, 16  ;;  %v942_v0 = vrot.slane %v940_v10, 4  ;;  %v945_v49 = vrot.slane %v943_v11, 5  ;;  %v2366_v8 = vld [vmem:[%s1985_s9 + $0x60] sm:$0xff] }
  0x4e   : > { %v732_v37 = vsel %vm2177_vm7, %v1683_v31, %v731_v60  ;;  %v758_v26 = vunpack.c.l.b16 %v735_v35  ;;  %v951_v52 = vrot.slane %v949_v12, 5  ;;  %v1684_v56 = vrot.slane %v2102_v62, 9 }
  0x4f   : > { %v757_v39 = vunpack.c.l.b16 %v732_v37  ;;  %v740_v57 = vrot.slane %v738_v44, 4  ;;  %v741_v58 = vrot.slane %v2116_v30, 5  ;;  %v955_v59 = vrot.slane %v953_v45, 4 }
  0x50   : > { %1699 = vmatmul.msk.bf16.vlgmr.msrb.gmra.mxu3 %vm482_vm3, %v1761_v42  ;;  %v946_v4 = vor.u32 %v945_v49, %v942_v0  ;;  %v739_v5 = vsel %vm2177_vm7, %v1684_v56, %v738_v44  ;;  %v959_v19 = vshll.u32 %v2334_v61, 16 }
  0x51   : > { %v742_v6 = vsel %vm2177_vm7, %v740_v57, %v741_v58  ;;  %v956_v62 = vor.u32 %v955_v59, %v951_v52  ;;  %v759_v7 = vunpack.c.l.b16 %v739_v5 }
  0x52   : > { %v760_v9 = vunpack.c.l.b16 %v742_v6  ;;  %v961_v18 = vrot.slane %v959_v19, 5 }
  0x53   : > { %v957_v15 = vrot.slane %v956_v62, 4 }
  0x54   : > { %1708 = vmatmul.msk.bf16.vlgmr.msrb.gmra.mxu0 %vm482_vm3, %v475_v14  ;;  %v1682_v14 = vrot.slane %v2082_v41, 9  ;;  %v2353_v55 = vpack.c.b16 %v760_v9, %v759_v7 }
  0x55   : > { %v962_v60 = vsel %vm2023_vm4, %v957_v15, %v961_v18 }
  0x56   : > { %1670 = vmatmul.msk.bf16.gmra.mxu1 %vm482_vm3, %v1761_v42  ;;  %v725_v21 = vsel %vm2177_vm7, %v1682_v14, %v724_v20  ;;  %v2315_v42 = vpack.c.b16 %v758_v26, %v757_v39  ;;  %v947_v14 = vrot.slane %v946_v4, 4  ;;  %v966_v37 = vunpack.c.l.b16 %v962_v60 }
  0x57   : > { %v755_v22 = vunpack.c.l.b16 %v725_v21 }
  0x59   : > { %v2287_v41 = vpack.c.b16 %v756_v23, %v755_v22  ;;  %v952_v23 = vsel %vm2023_vm4, %v947_v14, %v951_v52 }
  0x5a   : > { %v965_v28 = vunpack.c.l.b16 %v952_v23 }
  0x5c   : > { %1687 = vmatmul.msk.bf16.gmra.mxu2 %vm482_vm3, %v2219_v51  ;;  %v2372_v39 = vpack.c.b16 %v966_v37, %v965_v28 }
  0x60   : > { %1700 = vmatmul.msk.bf16.gmra.mxu3 %vm482_vm3, %v2228_v16 }
  0x64   : > { %1709 = vmatmul.msk.bf16.gmra.mxu0 %vm482_vm3, %v2042_v63 }
  0x66   : > { %1671 = vmatmul.msk.bf16.gmra.mxu1 %vm482_vm3, %v2228_v16 }
  0x6c   : > { %1688 = vmatmul.msk.bf16.gmra.mxu2 %vm482_vm3, %v2207_v43 }
  0x70   : > { %1701 = vmatmul.msk.bf16.gmra.mxu3 %vm482_vm3, %v2241_v33 }
  0x74   : > { %1710 = vmatmul.msk.bf16.gmra.mxu0 %vm482_vm3, %v2128_v50 }
  0x76   : > { %1672 = vmatmul.msk.bf16.gmra.mxu1 %vm482_vm3, %v2241_v33 }
  0x7c   : > { %1689 = vmatmul.msk.bf16.gmra.mxu2 %vm482_vm3, %v2230_v29 }
  0x80   : > { %1702 = vmatmul.msk.bf16.gmra.mxu3 %vm482_vm3, %v2253_v3 }
  0x84   : > { %1711 = vmatmul.msk.bf16.gmra.mxu0 %vm482_vm3, %v2065_v24 }
  0x86   : > { %1673 = vmatmul.msk.bf16.gmra.mxu1 %vm482_vm3, %v2253_v3 }
  0x8c   : > { %1690 = vmatmul.msk.bf16.gmra.mxu2 %vm482_vm3, %v2267_v17 }
  0x90   : > { %1703 = vmatmul.msk.bf16.gmra.mxu3 %vm482_vm3, %v2273_v13 }
  0x94   : > { %1712 = vmatmul.msk.bf16.gmra.mxu0 %vm482_vm3, %v2150_v32 }
  0x96   : > { %1674 = vmatmul.msk.bf16.gmra.mxu1 %vm482_vm3, %v2273_v13 }
  0x9c   : > { %1691 = vmatmul.msk.bf16.gmra.mxu2 %vm482_vm3, %v2287_v41 }
  0xa0   : > { %1704 = vmatmul.msk.bf16.gmra.mxu3 %vm482_vm3, %v2293_v25 }
  0xa1   : > { %v2299_v34 = vpop.f32.mrf.mxu1 }
  0xa4   : > { %1713 = vmatmul.msk.bf16.gmra.mxu0 %vm482_vm3, %v2086_v47 }
  0xa6   : > { %1675 = vmatmul.msk.bf16.gmra.mxu1 %vm482_vm3, %v2293_v25 }
  0xa9   : > { %v2320_v53 = vpop.f32.mrf.mxu1 }
  0xab   : > { %v2324_v48 = vpop.f32.mrf.mxu2 }
  0xac   : > { %1692 = vmatmul.msk.bf16.gmra.mxu2 %vm482_vm3, %v2315_v42 }
  0xaf   : > { %v520_v27 = vpop.f32.mrf.mxu0  ;;  %v2336_v2 = vpop.f32.mrf.mxu3 }
  0xb0   : > { %1705 = vmatmul.msk.bf16.gmra.mxu3 %vm482_vm3, %v2329_v38 }
  0xb3   : > { %v2345_v30 = vpop.f32.mrf.mxu1  ;;  %v2349_v20 = vpop.f32.mrf.mxu2 }
  0xb4   : > { %1714 = vmatmul.msk.bf16.gmra.mxu0 %vm482_vm3, %v2172_v1 }
  0xb6   : > { %1676 = vmatmul.msk.bf16.gmra.mxu1 %vm482_vm3, %v2329_v38 }
  0xb7   : > { %v522_v21 = vpop.f32.mrf.mxu0  ;;  %v2355_v22 = vpop.f32.mrf.mxu3 }
  0xbb   : > { %v2361_v31 = vpop.f32.mrf.mxu1 }
  0xbc   : > { %1693 = vmatmul.msk.bf16.gmra.mxu2 %vm482_vm3, %v2353_v55 }
  0xbf   : > { %v2368_v35 = vpop.f32.mrf.mxu2 }
  0xc0   : > { %1706 = vmatmul.msk.bf16.gmra.mxu3 %vm482_vm3, %v2366_v8 }
  0xc1   : > { %v525_v26 = vpop.f32.mrf.mxu0 }
  0xc3   : > { %v2374_v10 = vpop.f32.mrf.mxu3  ;;  %v636_v11 = vpop.f32.mrf.mxu1 }
  0xc4   : > { %1715 = vmatmul.msk.bf16.gmra.mxu0 %vm482_vm3, %v2372_v39  ;;  %v637_v12 = vadd.f32 %v636_v11, %v520_v27 }
  0xc6   : > { %1718 = vmatmul.msk.bf16.vlgmr.msra.gmra.mxu1 %vm482_vm3, %v2219_v51 }
  0xc7   : > { %v2380_v44 = vpop.f32.mrf.mxu2 }
  0xc9   : > { %v527_v45 = vpop.f32.mrf.mxu0 }
  0xcb   : > { %v2382_v0 = vpop.f32.mrf.mxu3  ;;  %v638_v49 = vpop.f32.mrf.mxu1 }
  0xcc   : > { %1731 = vmatmul.msk.bf16.vlgmr.msra.gmra.mxu2 %vm482_vm3, %v2228_v16  ;;  %v639_v52 = vadd.f32 %v638_v49, %v522_v21 }
  0xcf   : > { %v805_v56 = vpop.f32.mrf.mxu2 }
  0xd0   : > { %1740 = vmatmul.msk.bf16.vlgmr.msra.gmra.mxu3 %vm482_vm3, %v2042_v63  ;;  %v845_v57 = vadd.f32 %v805_v56, %v637_v12 }
  0xd1   : > { %v983_v58 = vpop.f32.mrf.mxu0 }
  0xd3   : > { %v883_v59 = vpop.f32.mrf.mxu3  ;;  %v641_v27 = vpop.f32.mrf.mxu1 }
  0xd4   : > { %1750 = vmatmul.msk.bf16.vlgmr.msra.gmra.mxu0 %vm482_vm3, %v2207_v43  ;;  %v923_v51 = vadd.f32 %v883_v59, %v845_v57  ;;  %v642_v4 = vadd.f32 %v641_v27, %v525_v26 }
  0xd6   : > { %1719 = vmatmul.msk.bf16.gmra.mxu1 %vm482_vm3, %v2207_v43  ;;  %v2392_v5 = vadd.f32 %v983_v58, %v923_v51 }
  0xd7   : > { %v807_v16 = vpop.f32.mrf.mxu2 }
  0xd8   : > { %v846_v6 = vadd.f32 %v807_v16, %v639_v52 }
  0xd9   : > { %v985_v62 = vpop.f32.mrf.mxu0 }
  0xdb   : > { %v885_v19 = vpop.f32.mrf.mxu3  ;;  %v643_v7 = vpop.f32.mrf.mxu1 }
  0xdc   : > { %v924_v63 = vadd.f32 %v885_v19, %v846_v6  ;;  %1732 = vmatmul.msk.bf16.gmra.mxu2 %vm482_vm3, %v2241_v33  ;;  %v644_v9 = vadd.f32 %v643_v7, %v527_v45 }
  0xde   : > { %v2396_v14 = vadd.f32 %v985_v62, %v924_v63 }
  0xdf   : > { %v810_v15 = vpop.f32.mrf.mxu2 }
  0xe0   : > { %1741 = vmatmul.msk.bf16.gmra.mxu3 %vm482_vm3, %v2128_v50  ;;  %v847_v18 = vadd.f32 %v810_v15, %v642_v4 }
  0xe1   : > { %v988_v43 = vpop.f32.mrf.mxu0 }
  0xe3   : > { %v888_v21 = vpop.f32.mrf.mxu3  ;;  %v646_v23 = vpop.f32.mrf.mxu1 }
  0xe4   : > { %1751 = vmatmul.msk.bf16.gmra.mxu0 %vm482_vm3, %v2230_v29  ;;  %v925_v60 = vadd.f32 %v888_v21, %v847_v18  ;;  %v647_v28 = vadd.f32 %v646_v23, %v2299_v34 }
  0xe6   : > { %1720 = vmatmul.msk.bf16.gmra.mxu1 %vm482_vm3, %v2230_v29  ;;  %v2405_v33 = vadd.f32 %v988_v43, %v925_v60 }
  0xe7   : > { %v812_v37 = vpop.f32.mrf.mxu2 }
  0xe8   : > { %v848_v26 = vadd.f32 %v812_v37, %v644_v9 }
  0xe9   : > { %v990_v11 = vpop.f32.mrf.mxu0 }
  0xeb   : > { %v890_v12 = vpop.f32.mrf.mxu3  ;;  %v648_v50 = vpop.f32.mrf.mxu1 }
  0xec   : > { %v926_v45 = vadd.f32 %v890_v12, %v848_v26  ;;  %1733 = vmatmul.msk.bf16.gmra.mxu2 %vm482_vm3, %v2253_v3  ;;  %v649_v49 = vadd.f32 %v648_v50, %v2320_v53 }
  0xee   : > { %v2410_v52 = vadd.f32 %v990_v11, %v926_v45 }
  0xef   : > { %v815_v56 = vpop.f32.mrf.mxu2 }
  0xf0   : > { %1742 = vmatmul.msk.bf16.gmra.mxu3 %vm482_vm3, %v2065_v24  ;;  %v849_v29 = vadd.f32 %v815_v56, %v647_v28 }
  0xf1   : > { %v993_v34 = vpop.f32.mrf.mxu0 }
  0xf3   : > { %v893_v57 = vpop.f32.mrf.mxu3  ;;  %v651_v58 = vpop.f32.mrf.mxu1 }
  0xf4   : > { %1752 = vmatmul.msk.bf16.gmra.mxu0 %vm482_vm3, %v2267_v17  ;;  %v927_v59 = vadd.f32 %v893_v57, %v849_v29  ;;  %v652_v27 = vadd.f32 %v651_v58, %v2345_v30 }
  0xf6   : > { %1721 = vmatmul.msk.bf16.gmra.mxu1 %vm482_vm3, %v2267_v17  ;;  %v2419_v3 = vadd.f32 %v993_v34, %v927_v59 }
  0xf7   : > { %v817_v53 = vpop.f32.mrf.mxu2 }
  0xf8   : > { %v850_v51 = vadd.f32 %v817_v53, %v649_v49  ;;  %v2457_v53 = vld [vmem:[%s1985_s9 + $0x6c] sm:$0xf] }
  0xf9   : > { %v995_v4 = vpop.f32.mrf.mxu0 }
  0xfb   : > { %v895_v16 = vpop.f32.mrf.mxu3  ;;  %v653_v24 = vpop.f32.mrf.mxu1 }
  0xfc   : > { %v928_v6 = vadd.f32 %v895_v16, %v850_v51  ;;  %1734 = vmatmul.msk.bf16.gmra.mxu2 %vm482_vm3, %v2273_v13  ;;  %v654_v62 = vadd.f32 %v653_v24, %v2361_v31  ;;  %v2460_v51 = vld [vmem:[%s1985_s9 + $0x70] sm:$0xf]  ;;  %v1202_v24 = vshrl.u32 %v2457_v53, 16 }
  0xfe   : > { %v2424_v19 = vadd.f32 %v995_v4, %v928_v6  ;;  %v1716_v6 = vrot.slane %v2308_v40, 9 }
  0xff   : > { %v820_v7 = vpop.f32.mrf.mxu2 }
 0x100   : > { %1743 = vmatmul.msk.bf16.gmra.mxu3 %vm482_vm3, %v2150_v32  ;;  %v851_v17 = vadd.f32 %v820_v7, %v652_v27  ;;  %v1042_v27 = vrot.slane %v2311_v46, 5  ;;  %v1215_v7 = vshrl.u32 %v2460_v51, 16 }
 0x101   : > { %v998_v30 = vpop.f32.mrf.mxu0 }
 0x102   : > { %v1044_v46 = vrot.slane %v1042_v27, 4  ;;  %v1043_v40 = vsel %vm2177_vm7, %v1716_v6, %v1042_v27 }
 0x103   : > { %v898_v63 = vpop.f32.mrf.mxu3  ;;  %v656_v9 = vpop.f32.mrf.mxu1 }
 0x104   : > { %1753 = vmatmul.msk.bf16.gmra.mxu0 %vm482_vm3, %v2287_v41  ;;  %v929_v15 = vadd.f32 %v898_v63, %v851_v17  ;;  %v657_v32 = vadd.f32 %v656_v9, %v2324_v48  ;;  %v1204_v9 = vrot.slane %v1202_v24, 4  ;;  %v1769_v24 = vld [vmem:[%s1985_s9 + $0x6c] sm:$0xff] }
 0x106   : > { %1722 = vmatmul.msk.bf16.gmra.mxu1 %vm482_vm3, %v2287_v41  ;;  %v2432_v13 = vadd.f32 %v998_v30, %v929_v15 }
 0x107   : > { %v822_v31 = vpop.f32.mrf.mxu2 }
 0x108   : > { %v852_v18 = vadd.f32 %v822_v31, %v654_v62  ;;  %v1211_v62 = vshll.u32 %v2460_v51, 16 }
 0x109   : > { %v1000_v43 = vpop.f32.mrf.mxu0 }
 0x10b   : > { %v900_v21 = vpop.f32.mrf.mxu3  ;;  %v658_v23 = vpop.f32.mrf.mxu1 }
 0x10c   : > { %v930_v60 = vadd.f32 %v900_v21, %v852_v18  ;;  %1735 = vmatmul.msk.bf16.gmra.mxu2 %vm482_vm3, %v2293_v25  ;;  %v659_v45 = vadd.f32 %v658_v23, %v2349_v20  ;;  %v1217_v21 = vrot.slane %v1215_v7, 4  ;;  %v259_v23 = vld [vmem:[%s1985_s9 + $0x74] sm:$0x1] }
 0x10e   : > { %v2437_v28 = vadd.f32 %v1000_v43, %v930_v60  ;;  %v1213_v43 = vrot.slane %v1211_v62, 5 }
 0x10f   : > { %v825_v37 = vpop.f32.mrf.mxu2 }
 0x110   : > { %1744 = vmatmul.msk.bf16.gmra.mxu3 %vm482_vm3, %v2086_v47  ;;  %v853_v41 = vadd.f32 %v825_v37, %v657_v32 }
 0x111   : > { %v1003_v26 = vpop.f32.mrf.mxu0 }
 0x113   : > { %v903_v11 = vpop.f32.mrf.mxu3  ;;  %v661_v12 = vpop.f32.mrf.mxu1 }
 0x114   : > { %1754 = vmatmul.msk.bf16.gmra.mxu0 %vm482_vm3, %v2315_v42  ;;  %v931_v50 = vadd.f32 %v903_v11, %v853_v41  ;;  %v662_v57 = vadd.f32 %v661_v12, %v2368_v35  ;;  %v1221_v11 = vshll.u32 %v259_v23, 16 }
 0x116   : > { %1723 = vmatmul.msk.bf16.gmra.mxu1 %vm482_vm3, %v2315_v42  ;;  %v2446_v25 = vadd.f32 %v1003_v26, %v931_v50  ;;  %v1218_v26 = vor.u32 %v1217_v21, %v1213_v43 }
 0x117   : > { %v827_v48 = vpop.f32.mrf.mxu2 }
 0x118   : > { %v854_v49 = vadd.f32 %v827_v48, %v659_v45 }
 0x119   : > { %v1005_v47 = vpop.f32.mrf.mxu0 }
 0x11b   : > { %v905_v56 = vpop.f32.mrf.mxu3  ;;  %v663_v29 = vpop.f32.mrf.mxu1 }
 0x11c   : > { %v932_v34 = vadd.f32 %v905_v56, %v854_v49  ;;  %1736 = vmatmul.msk.bf16.gmra.mxu2 %vm482_vm3, %v2329_v38  ;;  %v1045_v38 = vrot.slane %v2334_v61, 5  ;;  %v664_v17 = vadd.f32 %v663_v29, %v2380_v44  ;;  %v1219_v29 = vrot.slane %v1218_v26, 4 }
 0x11e   : > { %v2451_v58 = vadd.f32 %v1005_v47, %v932_v34  ;;  %v1046_v18 = vsel %vm2177_vm7, %v1044_v46, %v1045_v38  ;;  %v1223_v34 = vrot.slane %v1221_v11, 5 }
 0x11f   : > { %v830_v20 = vpop.f32.mrf.mxu2  ;;  %v1050_v37 = vunpack.c.l.b16 %v1046_v18 }
 0x120   : > { %1745 = vmatmul.msk.bf16.gmra.mxu3 %vm482_vm3, %v2172_v1  ;;  %v855_v42 = vadd.f32 %v830_v20, %v662_v57  ;;  %v1205_v1 = vshll.u32 %v2457_v53, 16 }
 0x121   : > { %v1008_v59 = vpop.f32.mrf.mxu0 }
 0x122   : > { %v1207_v15 = vrot.slane %v1205_v1, 5 }
 0x123   : > { %v908_v4 = vpop.f32.mrf.mxu3  ;;  %v666_v16 = vpop.f32.mrf.mxu1 }
 0x124   : > { %1755 = vmatmul.msk.bf16.gmra.mxu0 %vm482_vm3, %v2353_v55  ;;  %v933_v35 = vadd.f32 %v908_v4, %v855_v42  ;;  %v1208_v41 = vor.u32 %v1207_v15, %v1204_v9  ;;  %v667_v12 = vadd.f32 %v666_v16, %v2336_v2  ;;  %v1307_v4 = vrot.slane %v259_v23, 5 }
 0x126   : > { %1724 = vmatmul.msk.bf16.gmra.mxu1 %vm482_vm3, %v2353_v55  ;;  %v2473_v61 = vadd.f32 %v1008_v59, %v933_v35  ;;  %v1049_v55 = vunpack.c.l.b16 %v1043_v40  ;;  %v1209_v47 = vrot.slane %v1208_v41, 4  ;;  %v1748_v59 = vrot.slane %v2457_v53, 9 }
 0x127   : > { %v832_v30 = vpop.f32.mrf.mxu2 }
 0x128   : > { %v856_v63 = vadd.f32 %v832_v30, %v664_v17  ;;  %v1051_v48 = vpack.c.b16 %v1050_v37, %v1049_v55  ;;  %v1214_v42 = vsel %vm2023_vm4, %v1209_v47, %v1213_v43 }
 0x129   : > { %v1010_v31 = vpop.f32.mrf.mxu0  ;;  %v1227_v1 = vunpack.c.l.b16 %v1214_v42 }
 0x12b   : > { %v910_v44 = vpop.f32.mrf.mxu3  ;;  %v668_v60 = vpop.f32.mrf.mxu1 }
 0x12c   : > { %v934_v32 = vadd.f32 %v910_v44, %v856_v63  ;;  %1737 = vmatmul.msk.bf16.gmra.mxu2 %vm482_vm3, %v2366_v8  ;;  %v1304_v8 = vrot.slane %v2460_v51, 5  ;;  %v669_v16 = vadd.f32 %v668_v60, %v2355_v22 }
 0x12e   : > { %v2483_v50 = vadd.f32 %v1010_v31, %v934_v32  ;;  %v1306_v27 = vrot.slane %v1304_v8, 4  ;;  %v1305_v36 = vsel %vm2177_vm7, %v1748_v59, %v1304_v8 }
 0x12f   : > { %v835_v45 = vpop.f32.mrf.mxu2  ;;  %v1311_v30 = vunpack.c.l.b16 %v1305_v36 }
 0x130   : > { %1746 = vmatmul.msk.bf16.gmra.mxu3 %vm482_vm3, %v2372_v39  ;;  %v857_v49 = vadd.f32 %v835_v45, %v667_v12  ;;  %v1224_v39 = vsel %vm2023_vm4, %v1219_v29, %v1223_v34  ;;  %v1308_v53 = vsel %vm2177_vm7, %v1306_v27, %v1307_v4 }
 0x131   : > { %v1013_v56 = vpop.f32.mrf.mxu0  ;;  %v1228_v6 = vunpack.c.l.b16 %v1224_v39  ;;  %v1312_v63 = vunpack.c.l.b16 %v1308_v53 }
 0x133   : > { %v913_v57 = vpop.f32.mrf.mxu3  ;;  %v671_v20 = vpop.f32.mrf.mxu1  ;;  %v1229_v22 = vpack.c.b16 %v1228_v6, %v1227_v1  ;;  %v1313_v40 = vpack.c.b16 %v1312_v63, %v1311_v30 }
 0x134   : > { %1756 = vmatmul.msk.bf16.gmra.mxu0 %vm482_vm3, %v1051_v48  ;;  %v935_v2 = vadd.f32 %v913_v57, %v857_v49  ;;  %v672_v9 = vadd.f32 %v671_v20, %v2374_v10 }
 0x136   : > { %1725 = vmatmul.msk.bf16.gmra.mxu1 %vm482_vm3, %v1051_v48  ;;  %v2496_v51 = vadd.f32 %v1013_v56, %v935_v2 }
 0x137   : > { %v837_v38 = vpop.f32.mrf.mxu2 }
 0x138   : > { %v858_v35 = vadd.f32 %v837_v38, %v669_v16 }
 0x139   : > { %v1015_v46 = vpop.f32.mrf.mxu0 }
 0x13b   : > { %v915_v62 = vpop.f32.mrf.mxu3  ;;  %v673_v7 = vpop.f32.mrf.mxu1 }
 0x13c   : > { %v936_v17 = vadd.f32 %v915_v62, %v858_v35  ;;  %1738 = vmatmul.msk.bf16.gmra.mxu2 %vm482_vm3, %v1769_v24  ;;  %v674_v44 = vadd.f32 %v673_v7, %v2382_v0 }
 0x13e   : > { %v2505_v15 = vadd.f32 %v1015_v46, %v936_v17 }
 0x13f   : > { %v840_v31 = vpop.f32.mrf.mxu2 }
 0x140   : > { %1747 = vmatmul.msk.bf16.gmra.mxu3 %vm482_vm3, %v1229_v22  ;;  %v859_v18 = vadd.f32 %v840_v31, %v672_v9 }
 0x141   : > { %v1018_v54 = vpop.f32.mrf.mxu0 }
 0x143   : > { %v918_v43 = vpop.f32.mrf.mxu3  ;;  %v1067_v21 = vpop.f32.mrf.mxu1 }
 0x144   : > { %1757 = vmatmul.msk.bf16.gmra.mxu0 %vm482_vm3, %v1313_v40  ;;  %v937_v23 = vadd.f32 %v918_v43, %v859_v18  ;;  %v1107_v45 = vadd.f32 %v1067_v21, %v2392_v5 }
 0x146   : > { %v2510_v60 = vadd.f32 %v1018_v54, %v937_v23 }
 0x147   : > { %v842_v32 = vpop.f32.mrf.mxu2 }
 0x148   : > { %v860_v10 = vadd.f32 %v842_v32, %v674_v44 }
 0x149   : > { %v1020_v55 = vpop.f32.mrf.mxu0 }
 0x14b   : > { %v920_v37 = vpop.f32.mrf.mxu3  ;;  %v1069_v41 = vpop.f32.mrf.mxu1 }
 0x14c   : > { %v938_v26 = vadd.f32 %v920_v37, %v860_v10  ;;  %v1108_v56 = vadd.f32 %v1069_v41, %v2396_v14 }
 0x14e   : > { %v2513_v11 = vadd.f32 %v1020_v55, %v938_v26 }
 0x14f   : > { %v1145_v12 = vpop.f32.mrf.mxu2 }
 0x150   : > { %v1185_v49 = vadd.f32 %v1145_v12, %v1107_v45 }
 0x151   : > { %v1329_v48 = vpop.f32.mrf.mxu0 }
 0x153   : > { %v1245_v47 = vpop.f32.mrf.mxu3  ;;  %v1072_v0 = vpop.f32.mrf.mxu1 }
 0x154   : > { %v1285_v29 = vadd.f32 %v1245_v47, %v1185_v49  ;;  %v1109_v59 = vadd.f32 %v1072_v0, %v2405_v33 }
 0x156   : > { %v1369_v20 = vadd.f32 %v1329_v48, %v1285_v29 }
 0x157   : > { %v1147_v34 = vpop.f32.mrf.mxu2 }
 0x158   : > { %v1186_v8 = vadd.f32 %v1147_v34, %v1108_v56  ;;  %v1439_v27 = vmul.f32 %v1369_v20, %v1369_v20 }
 0x159   : > { %v1331_v57 = vpop.f32.mrf.mxu0 }
 0x15b   : > { %v1247_v2 = vpop.f32.mrf.mxu3  ;;  %v1074_v42 = vpop.f32.mrf.mxu1 }
 0x15c   : > { %v1286_v39 = vadd.f32 %v1247_v2, %v1186_v8  ;;  %v1110_v33 = vadd.f32 %v1074_v42, %v2410_v52 }
 0x15e   : > { %v1370_v5 = vadd.f32 %v1331_v57, %v1286_v39 }
 0x15f   : > { %v1150_v14 = vpop.f32.mrf.mxu2 }
 0x160   : > { %v1773_v4 = vpack.c.bf16 %v1370_v5, %v1369_v20  ;;  %v1417_v16 = vadd.f32 %v1370_v5, %v1369_v20  ;;  %v1440_v38 = vmul.f32 %v1370_v5, %v1370_v5  ;;  %v1187_v35 = vadd.f32 %v1150_v14, %v1109_v59 }
 0x161   : > { %v1334_v24 = vpop.f32.mrf.mxu0 }
 0x162   : > { %1774 = vst [vmem:[%s2522_s4] sm:$0xff] %v1773_v4   ;;  %v1455_v1 = vadd.f32 %v1440_v38, %v1439_v27 }
 0x163   : > { %v1250_v6 = vpop.f32.mrf.mxu3  ;;  %v1077_v46 = vpop.f32.mrf.mxu1 }
 0x164   : > { %v1287_v36 = vadd.f32 %v1250_v6, %v1187_v35  ;;  %v1111_v54 = vadd.f32 %v1077_v46, %v2419_v3 }
 0x166   : > { %v1371_v53 = vadd.f32 %v1334_v24, %v1287_v36 }
 0x167   : > { %v1152_v62 = vpop.f32.mrf.mxu2 }
 0x168   : > { %v1418_v7 = vadd.f32 %v1417_v16, %v1371_v53  ;;  %v1441_v17 = vmul.f32 %v1371_v53, %v1371_v53  ;;  %v1188_v22 = vadd.f32 %v1152_v62, %v1110_v33 }
 0x169   : > { %v1336_v30 = vpop.f32.mrf.mxu0 }
 0x16a   : > { %v1456_v63 = vadd.f32 %v1455_v1, %v1441_v17 }
 0x16b   : > { %v1252_v9 = vpop.f32.mrf.mxu3  ;;  %v1079_v31 = vpop.f32.mrf.mxu1 }
 0x16c   : > { %v1288_v40 = vadd.f32 %v1252_v9, %v1188_v22  ;;  %v1112_v12 = vadd.f32 %v1079_v31, %v2424_v19 }
 0x16e   : > { %v1372_v18 = vadd.f32 %v1336_v30, %v1288_v40 }
 0x16f   : > { %v1155_v43 = vpop.f32.mrf.mxu2 }
 0x170   : > { %v1778_v21 = vpack.c.bf16 %v1372_v18, %v1371_v53  ;;  %v1419_v23 = vadd.f32 %v1418_v7, %v1372_v18  ;;  %v1442_v44 = vmul.f32 %v1372_v18, %v1372_v18  ;;  %v1189_v32 = vadd.f32 %v1155_v43, %v1111_v54 }
 0x171   : > { %v1339_v10 = vpop.f32.mrf.mxu0 }
 0x172   : > { %1810 = vst [vmem:[%s2522_s4 + $0x8] sm:$0xff] %v1778_v21   ;;  %v1457_v52 = vadd.f32 %v1456_v63, %v1442_v44 }
 0x173   : > { %v1255_v55 = vpop.f32.mrf.mxu3  ;;  %v1082_v37 = vpop.f32.mrf.mxu1 }
 0x174   : > { %v1289_v41 = vadd.f32 %v1255_v55, %v1189_v32  ;;  %v1113_v57 = vadd.f32 %v1082_v37, %v2432_v13 }
 0x176   : > { %v1373_v26 = vadd.f32 %v1339_v10, %v1289_v41 }
 0x177   : > { %v1157_v45 = vpop.f32.mrf.mxu2 }
 0x178   : > { %v1420_v48 = vadd.f32 %v1419_v23, %v1373_v26  ;;  %v1443_v49 = vmul.f32 %v1373_v26, %v1373_v26  ;;  %v1190_v47 = vadd.f32 %v1157_v45, %v1112_v12 }
 0x179   : > { %v1341_v3 = vpop.f32.mrf.mxu0 }
 0x17a   : > { %v1458_v0 = vadd.f32 %v1457_v52, %v1443_v49 }
 0x17b   : > { %v1257_v56 = vpop.f32.mrf.mxu3  ;;  %v1084_v29 = vpop.f32.mrf.mxu1 }
 0x17c   : > { %v1290_v34 = vadd.f32 %v1257_v56, %v1190_v47  ;;  %v1114_v38 = vadd.f32 %v1084_v29, %v2437_v28 }
 0x17e   : > { %v1374_v8 = vadd.f32 %v1341_v3, %v1290_v34 }
 0x17f   : > { %v1160_v20 = vpop.f32.mrf.mxu2 }
 0x180   : > { %v1783_v2 = vpack.c.bf16 %v1374_v8, %v1373_v26  ;;  %v1421_v42 = vadd.f32 %v1420_v48, %v1374_v8  ;;  %v1444_v39 = vmul.f32 %v1374_v8, %v1374_v8  ;;  %v1191_v5 = vadd.f32 %v1160_v20, %v1113_v57 }
 0x181   : > { %v1344_v59 = vpop.f32.mrf.mxu0 }
 0x182   : > { %1811 = vst [vmem:[%s2522_s4 + $0x10] sm:$0xff] %v1783_v2   ;;  %v1459_v19 = vadd.f32 %v1458_v0, %v1444_v39 }
 0x183   : > { %v1260_v27 = vpop.f32.mrf.mxu3  ;;  %v1087_v14 = vpop.f32.mrf.mxu1 }
 0x184   : > { %v1291_v4 = vadd.f32 %v1260_v27, %v1191_v5  ;;  %v1115_v7 = vadd.f32 %v1087_v14, %v2446_v25 }
 0x186   : > { %v1375_v16 = vadd.f32 %v1344_v59, %v1291_v4 }
 0x187   : > { %v1162_v35 = vpop.f32.mrf.mxu2 }
 0x188   : > { %v1422_v24 = vadd.f32 %v1421_v42, %v1375_v16  ;;  %v1445_v1 = vmul.f32 %v1375_v16, %v1375_v16  ;;  %v1192_v6 = vadd.f32 %v1162_v35, %v1114_v38 }
 0x189   : > { %v1346_v13 = vpop.f32.mrf.mxu0 }
 0x18a   : > { %v1460_v46 = vadd.f32 %v1459_v19, %v1445_v1 }
 0x18b   : > { %v1262_v36 = vpop.f32.mrf.mxu3  ;;  %v1089_v53 = vpop.f32.mrf.mxu1 }
 0x18c   : > { %v1292_v33 = vadd.f32 %v1262_v36, %v1192_v6  ;;  %v1116_v21 = vadd.f32 %v1089_v53, %v2451_v58 }
 0x18e   : > { %v1376_v62 = vadd.f32 %v1346_v13, %v1292_v33 }
 0x18f   : > { %v1165_v17 = vpop.f32.mrf.mxu2 }
 0x190   : > { %v1788_v22 = vpack.c.bf16 %v1376_v62, %v1375_v16  ;;  %v1423_v30 = vadd.f32 %v1422_v24, %v1376_v62  ;;  %v1446_v63 = vmul.f32 %v1376_v62, %v1376_v62  ;;  %v1193_v9 = vadd.f32 %v1165_v17, %v1115_v7 }
 0x191   : > { %v1349_v31 = vpop.f32.mrf.mxu0 }
 0x192   : > { %1812 = vst [vmem:[%s2522_s4 + $0x18] sm:$0xff] %v1788_v22   ;;  %v1461_v28 = vadd.f32 %v1460_v46, %v1446_v63 }
 0x193   : > { %v1265_v40 = vpop.f32.mrf.mxu3  ;;  %v1092_v18 = vpop.f32.mrf.mxu1 }
 0x194   : > { %v1293_v54 = vadd.f32 %v1265_v40, %v1193_v9  ;;  %v1117_v12 = vadd.f32 %v1092_v18, %v2473_v61 }
 0x196   : > { %v1377_v43 = vadd.f32 %v1349_v31, %v1293_v54 }
 0x197   : > { %v1167_v23 = vpop.f32.mrf.mxu2 }
 0x198   : > { %v1424_v44 = vadd.f32 %v1423_v30, %v1377_v43  ;;  %v1447_v32 = vmul.f32 %v1377_v43, %v1377_v43  ;;  %v1194_v10 = vadd.f32 %v1167_v23, %v1116_v21 }
 0x199   : > { %v1351_v25 = vpop.f32.mrf.mxu0 }
 0x19a   : > { %v1462_v52 = vadd.f32 %v1461_v28, %v1447_v32 }
 0x19b   : > { %v1267_v55 = vpop.f32.mrf.mxu3  ;;  %v1094_v37 = vpop.f32.mrf.mxu1 }
 0x19c   : > { %v1294_v41 = vadd.f32 %v1267_v55, %v1194_v10  ;;  %v1118_v57 = vadd.f32 %v1094_v37, %v2483_v50 }
 0x19e   : > { %v1378_v26 = vadd.f32 %v1351_v25, %v1294_v41 }
 0x19f   : > { %v1170_v45 = vpop.f32.mrf.mxu2 }
 0x1a0   : > { %v1793_v48 = vpack.c.bf16 %v1378_v26, %v1377_v43  ;;  %v1425_v49 = vadd.f32 %v1424_v44, %v1378_v26  ;;  %v1448_v47 = vmul.f32 %v1378_v26, %v1378_v26  ;;  %v1195_v3 = vadd.f32 %v1170_v45, %v1117_v12 }
 0x1a1   : > { %v1354_v0 = vpop.f32.mrf.mxu0 }
 0x1a2   : > { %1813 = vst [vmem:[%s2522_s4 + $0x20] sm:$0xff] %v1793_v48   ;;  %v1463_v58 = vadd.f32 %v1462_v52, %v1448_v47 }
 0x1a3   : > { %v1270_v56 = vpop.f32.mrf.mxu3  ;;  %v1097_v34 = vpop.f32.mrf.mxu1 }
 0x1a4   : > { %v1295_v29 = vadd.f32 %v1270_v56, %v1195_v3  ;;  %v1119_v14 = vadd.f32 %v1097_v34, %v2496_v51 }
 0x1a6   : > { %v1379_v8 = vadd.f32 %v1354_v0, %v1295_v29 }
 0x1a7   : > { %v1172_v20 = vpop.f32.mrf.mxu2 }
 0x1a8   : > { %v1426_v2 = vadd.f32 %v1425_v49, %v1379_v8  ;;  %v1449_v42 = vmul.f32 %v1379_v8, %v1379_v8  ;;  %v1196_v39 = vadd.f32 %v1172_v20, %v1118_v57 }
 0x1a9   : > { %v1356_v61 = vpop.f32.mrf.mxu0 }
 0x1aa   : > { %v1464_v5 = vadd.f32 %v1463_v58, %v1449_v42 }
 0x1ab   : > { %v1272_v59 = vpop.f32.mrf.mxu3  ;;  %v1099_v4 = vpop.f32.mrf.mxu1 }
 0x1ac   : > { %v1296_v19 = vadd.f32 %v1272_v59, %v1196_v39  ;;  %v1120_v53 = vadd.f32 %v1099_v4, %v2505_v15 }
 0x1ae   : > { %v1380_v27 = vadd.f32 %v1356_v61, %v1296_v19 }
 0x1af   : > { %v1175_v16 = vpop.f32.mrf.mxu2 }
 0x1b0   : > { %v1798_v38 = vpack.c.bf16 %v1380_v27, %v1379_v8  ;;  %v1427_v35 = vadd.f32 %v1426_v2, %v1380_v27  ;;  %v1450_v24 = vmul.f32 %v1380_v27, %v1380_v27  ;;  %v1197_v1 = vadd.f32 %v1175_v16, %v1119_v14 }
 0x1b1   : > { %v1359_v6 = vpop.f32.mrf.mxu0 }
 0x1b2   : > { %1814 = vst [vmem:[%s2522_s4 + $0x28] sm:$0xff] %v1798_v38   ;;  %v1465_v50 = vadd.f32 %v1464_v5, %v1450_v24 }
 0x1b3   : > { %v1275_v13 = vpop.f32.mrf.mxu3  ;;  %v1102_v51 = vpop.f32.mrf.mxu1 }
 0x1b4   : > { %v1297_v46 = vadd.f32 %v1275_v13, %v1197_v1  ;;  %v1121_v28 = vadd.f32 %v1102_v51, %v2510_v60 }
 0x1b6   : > { %v1381_v36 = vadd.f32 %v1359_v6, %v1297_v46 }
 0x1b7   : > { %v1177_v33 = vpop.f32.mrf.mxu2 }
 0x1b8   : > { %v1428_v62 = vadd.f32 %v1427_v35, %v1381_v36  ;;  %v1451_v7 = vmul.f32 %v1381_v36, %v1381_v36  ;;  %v1198_v17 = vadd.f32 %v1177_v33, %v1120_v53 }
 0x1b9   : > { %v1361_v22 = vpop.f32.mrf.mxu0 }
 0x1ba   : > { %v1466_v30 = vadd.f32 %v1465_v50, %v1451_v7 }
 0x1bb   : > { %v1277_v63 = vpop.f32.mrf.mxu3  ;;  %v1104_v23 = vpop.f32.mrf.mxu1 }
 0x1bc   : > { %v1298_v9 = vadd.f32 %v1277_v63, %v1198_v17  ;;  %v1122_v52 = vadd.f32 %v1104_v23, %v2513_v11 }
 0x1be   : > { %v1382_v31 = vadd.f32 %v1361_v22, %v1298_v9 }
 0x1bf   : > { %v1180_v40 = vpop.f32.mrf.mxu2 }
 0x1c0   : > { %v1803_v18 = vpack.c.bf16 %v1382_v31, %v1381_v36  ;;  %v1429_v54 = vadd.f32 %v1428_v62, %v1382_v31  ;;  %v1452_v43 = vmul.f32 %v1382_v31, %v1382_v31  ;;  %v1199_v21 = vadd.f32 %v1180_v40, %v1121_v28 }
 0x1c1   : > { %v1364_v44 = vpop.f32.mrf.mxu0 }
 0x1c2   : > { %1815 = vst [vmem:[%s2522_s4 + $0x30] sm:$0xff] %v1803_v18   ;;  %v1467_v15 = vadd.f32 %v1466_v30, %v1452_v43 }
 0x1c3   : > { %v1280_v32 = vpop.f32.mrf.mxu3 }
 0x1c4   : > { %v1299_v10 = vadd.f32 %v1280_v32, %v1199_v21 }
 0x1c6   : > { %v1383_v25 = vadd.f32 %v1364_v44, %v1299_v10 }
 0x1c7   : > { %v1182_v55 = vpop.f32.mrf.mxu2 }
 0x1c8   : > { %v1430_v37 = vadd.f32 %v1429_v54, %v1383_v25  ;;  %v1453_v41 = vmul.f32 %v1383_v25, %v1383_v25  ;;  %v1200_v60 = vadd.f32 %v1182_v55, %v1122_v52 }
 0x1c9   : > { %v1366_v48 = vpop.f32.mrf.mxu0 }
 0x1ca   : > { %v1468_v26 = vadd.f32 %v1467_v15, %v1453_v41 }
 0x1cb   : > { %v1282_v12 = vpop.f32.mrf.mxu3 }
 0x1cc   : > { %v1300_v45 = vadd.f32 %v1282_v12, %v1200_v60 }
 0x1ce   : > { %v1384_v49 = vadd.f32 %v1366_v48, %v1300_v45 }
 0x1d0   : > { %v1808_v47 = vpack.c.bf16 %v1384_v49, %v1383_v25  ;;  %v1431_v3 = vadd.f32 %v1430_v37, %v1384_v49  ;;  %v1454_v0 = vmul.f32 %v1384_v49, %v1384_v49 }
 0x1d2   : > { %1816 = vst [vmem:[%s2522_s4 + $0x38] sm:$0xff] %v1808_v47   ;;  %v1432_v58 = vrot.slane %v1431_v3, 4  ;;  %v1469_v56 = vadd.f32 %v1468_v26, %v1454_v0 }
 0x1d4   : > { %v1433_v29 = vadd.f32 %v1432_v58, %v1431_v3  ;;  %v1470_v34 = vrot.slane %v1469_v56, 4 }
 0x1d6   : > { %v1434_v11 = vrot.slane %v1433_v29, 2  ;;  %v1471_v8 = vadd.f32 %v1470_v34, %v1469_v56 }
 0x1d8   : > { %v1435_v57 = vadd.f32 %v1434_v11, %v1433_v29  ;;  %v1472_v20 = vrot.slane %v1471_v8, 2 }
 0x1da   : > { %v1436_v2 = vrot.slane %v1435_v57, 1  ;;  %v1473_v42 = vadd.f32 %v1472_v20, %v1471_v8 }
 0x1dc   : > { %v1437_v39 = vadd.f32 %v1436_v2, %v1435_v57  ;;  %v1474_v61 = vrot.slane %v1473_v42, 1 }
 0x1de   : > { %1438 = vst [vmem:[%s228_s10] sm:$0x1] %v1437_v39  ;;  %v1475_v5 = vadd.f32 %v1474_v61, %v1473_v42 }
 0x1e0   : > { %1476 = vst [vmem:[%s228_s10 + $0x1] sm:$0x1] %v1475_v5 }
 0x1e1 PF: > { %s14_s16 = sadd.s32 1, %s1900_s16   ;;  %s2573_s12 = smov %s1892_s14 }
 0x1e2   : > { %p11_p8 = scmp.ge.s32.totalorder %s14_s16, 6   ;;  %s2574_s13 = smov %s1896_s15 }
 0x1e3   : > { %s2575_s14 = smov %s2578_s17  ;;  %s2576_s15 = smov %s2582_s18 }
 0x1e4   :  { %13 = sbr.rel (!%p11_p8) target bundleno = 3 (0x3), region = 78 }

</bundles_post_ra>
